<compile_context>
chip_gen: v5e
topology: v5e:2x2
jax: 0.10.0
libtpu: 0.0.40
codegen_flags: <defaults>
</compile_context>

<pallas_src>
import functools
import math

import jax
import jax.numpy as jnp
from jax.experimental import pallas as pl
from jax.experimental.pallas import tpu as pltpu


def _conv_kernel(x_ref, w_ref, b_ref, o_ref, acc_ref, *, KHs, KWs, TR, OW, Cs):
    """One (image, output-row-block) step of a stride-1 NHWC conv.

    x_ref  : (1, Hs, Ws, Cs)     bf16  whole transformed image (resident across row blocks)
    w_ref  : (KHs, KWs*Cs, OCp)  bf16  repacked weights (resident)
    b_ref  : (1, OCp)            f32   bias (resident)
    o_ref  : (1, TR*OW, OCp)     bf16  output row block, spatial flattened
    acc_ref: (TR*OW, OCp)        f32   VMEM scratch accumulator
    """
    r = pl.program_id(1)
    row0 = pl.multiple_of(r * TR, 8)   # TR is a multiple of 8
    K = KWs * Cs

    for kh in range(KHs):              # static unroll: KHs is small (<= kernel height)
        # Fold KW (and the stride phases already folded into Cs) into the
        # contraction dim: concatenate the KWs shifted views along channels.
        views = [x_ref[0, pl.ds(row0 + kh, TR), pl.ds(kw, OW), :]
                 for kw in range(KWs)]
        a = views[0] if KWs == 1 else jnp.concatenate(views, axis=-1)
        a = a.reshape(TR * OW, K)                                   # (M, KWs*Cs)
        part = jnp.dot(a, w_ref[kh], preferred_element_type=jnp.float32)
        if kh == 0:
            acc_ref[...] = part + b_ref[...]                        # bias folded into init
        else:
            acc_ref[...] += part

    o_ref[0] = acc_ref[...].astype(o_ref.dtype)


def conv2d_pallas(x, w, b, stride=1, padding=0):
    """x: (N, C, H, W) f32; w: (OC, C, KH, KW) f32; b: (OC,) f32 or None."""
    N, C, H, W = x.shape
    OC, _, KH, KW = w.shape
    s = int(stride)
    p = int(padding)

    # Matches the PyTorch module: weight scaled by 1/sqrt(in_planes * k * k).
    fan_in = C * KH * KW
    w_scaled = (w / math.sqrt(fan_in)).astype(jnp.float32)

    Hp, Wp = H + 2 * p, W + 2 * p
    OH = (Hp - KH) // s + 1
    OW = (Wp - KW) // s + 1
    assert OH > 0 and OW > 0, "empty output"

    # Lane-dense output channels (multiple of 128).
    OCp = ((OC + 127) // 128) * 128

    # Space-to-depth sizes (identity for stride == 1).
    KHs = (KH - 1) // s + 1
    KWs = (KW - 1) // s + 1
    Cs = s * s * C

    # Output-row tile: multiple of 8, sized so the f32 accumulator stays ~<= 2 MiB.
    bytes_per_out_row = OW * OCp * 4
    TR = max(1, (2 * 1024 * 1024) // bytes_per_out_row)
    TR = min(256, max(8, (TR // 8) * 8))
    if TR >= OH:
        TR = max(8, ((OH + 7) // 8) * 8)      # single row block
    OHp = ((OH + TR - 1) // TR) * TR
    R = OHp // TR

    # Transformed (space-to-depth) spatial extents the kernel slices from.
    Hs = OHp + KHs - 1
    Ws = OW + KWs - 1

    # ---- glue: NHWC, spatial pad, space-to-depth, bf16 (one input-sized pass) ----
    x_nhwc = jnp.transpose(x, (0, 2, 3, 1))                      # (N, H, W, C)
    xp = jnp.pad(x_nhwc, ((0, 0), (p, p), (p, p), (0, 0)))       # (N, Hp, Wp, C)
    Ht, Wt = Hs * s, Ws * s
    xp = xp[:, :min(Hp, Ht), :min(Wp, Wt), :]                    # drop never-used edge
    xp = jnp.pad(xp, ((0, 0), (0, Ht - xp.shape[1]), (0, Wt - xp.shape[2]), (0, 0)))
    x_s = xp.reshape(N, Hs, s, Ws, s, C).transpose(0, 1, 3, 2, 4, 5)
    x_s = x_s.reshape(N, Hs, Ws, Cs).astype(jnp.bfloat16)

    # ---- weights: (OC, C, KH, KW) -> space-to-depth -> (KHs, KWs*Cs, OCp) bf16 ----
    w_hwio = jnp.transpose(w_scaled, (2, 3, 1, 0))               # (KH, KW, C, OC)
    w_s = jnp.zeros((KHs, KWs, s, s, C, OC), jnp.float32)
    for kh in range(KH):
        for kw in range(KW):
            w_s = w_s.at[kh // s, kw // s, kh % s, kw % s].set(w_hwio[kh, kw])
    w_s = w_s.reshape(KHs, KWs * Cs, OC)
    w_s = jnp.pad(w_s, ((0, 0), (0, 0), (0, OCp - OC))).astype(jnp.bfloat16)

    bias = b if b is not None else jnp.zeros((OC,), jnp.float32)
    bias_p = jnp.pad(bias.astype(jnp.float32), (0, OCp - OC)).reshape(1, OCp)

    kernel = functools.partial(
        _conv_kernel, KHs=KHs, KWs=KWs, TR=TR, OW=OW, Cs=Cs)

    # Scoped VMEM: 48 MiB is safe everywhere (v7x has 64 MiB physical); raise to
    # 96 MiB where 128 MiB physical VMEM exists (v5e/v6e).
    vmem_limit = 48 * 1024 * 1024
    try:
        if int(pltpu.get_tpu_info().vmem_capacity_bytes) >= 96 * 1024 * 1024:
            vmem_limit = 96 * 1024 * 1024
    except Exception:
        pass

    out = pl.pallas_call(
        kernel,
        out_shape=jax.ShapeDtypeStruct((N, OHp * OW, OCp), jnp.bfloat16),
        grid_spec=pltpu.PrefetchScalarGridSpec(
            num_scalar_prefetch=0,
            grid=(N, R),
            in_specs=[
                # Whole transformed image; constant index across r -> DMA'd once per n.
                pl.BlockSpec((1, Hs, Ws, Cs), lambda n, r: (n, 0, 0, 0)),
                # Weights / bias resident (constant index_map -> no re-DMA).
                pl.BlockSpec((KHs, KWs * Cs, OCp), lambda n, r: (0, 0, 0)),
                pl.BlockSpec((1, OCp), lambda n, r: (0, 0)),
            ],
            out_specs=pl.BlockSpec((1, TR * OW, OCp), lambda n, r: (n, r, 0)),
            scratch_shapes=[pltpu.VMEM((TR * OW, OCp), jnp.float32)],
        ),
        compiler_params=pltpu.CompilerParams(
            dimension_semantics=("parallel", "parallel"),
            vmem_limit_bytes=vmem_limit,
        ),
    )(x_s, w_s, bias_p)

    # bf16 -> drop OH/OC padding -> NCHW -> f32 (fused into one XLA pass).
    out = out.reshape(N, OHp, OW, OCp)[:, :OH, :, :OC]
    return jnp.transpose(out, (0, 3, 1, 2)).astype(jnp.float32)


def reference_conv(x, w, b, stride, padding):
    fan_in = w.shape[1] * w.shape[2] * w.shape[3]
    w_scaled = w / math.sqrt(fan_in)
    out = jax.lax.conv_general_dilated(
        x, w_scaled,
        window_strides=(stride, stride),
        padding=[(padding, padding), (padding, padding)],
        dimension_numbers=("NCHW", "OIHW", "NCHW"),
    )
    if b is not None:
        out = out + b.reshape(1, -1, 1, 1)
    return out


if __name__ == "__main__":
    # Small deterministic setup consistent with the module's forward.
    N, C, H, W = 2, 4, 16, 16
    OC, KS, STRIDE, PAD = 8, 3, 1, 1

    key = jax.random.PRNGKey(0)
    kx, kw = jax.random.split(key)
    x = jax.random.normal(kx, (N, C, H, W), dtype=jnp.float32)
    w = jax.random.normal(kw, (OC, C, KS, KS), dtype=jnp.float32)  # torch.randn equiv
    b = jnp.zeros((OC,), dtype=jnp.float32)                        # torch.zeros equiv

    out = conv2d_pallas(x, w, b, stride=STRIDE, padding=PAD)
    out = jax.block_until_ready(out)

    ref = reference_conv(x, w, b, STRIDE, PAD)
    assert out.shape == ref.shape, (out.shape, ref.shape)
    # bf16 inputs/weights/output with f32 accumulation -> tolerance reflects bf16.
    assert jnp.allclose(out, ref, atol=5e-2, rtol=5e-2), float(
        jnp.max(jnp.abs(out - ref))
    )
    print("KERNEL_OK")
</pallas_src>

<mosaic_0001>
module attributes {stable_mosaic.version = 11 : i64} {
  func.func @_conv_kernel(%arg0: i32, %arg1: i32, %arg2: memref<1x18x18x4xbf16, #tpu.memory_space<vmem>>, %arg3: memref<3x12x128xbf16, #tpu.memory_space<vmem>>, %arg4: memref<1x128xf32, #tpu.memory_space<vmem>>, %arg5: memref<1x256x128xbf16, #tpu.memory_space<vmem>>, %arg6: memref<256x128xf32, #tpu.memory_space<vmem>>) attributes {dimension_semantics = [#tpu.dimension_semantics<parallel>, #tpu.dimension_semantics<parallel>], iteration_bounds = array<i64: 2, 1>, scalar_prefetch = 0 : i64, scratch_operands = 1 : i64, tpu.core_type = #tpu.core_type<tc>, window_params = [{transform_indices = @transform_0, window_bounds = array<i64: 1, 18, 18, 4>}, {pipeline_mode = #tpu.pipeline_mode<synchronous>, transform_indices = @transform_1, window_bounds = array<i64: 3, 12, 128>}, {pipeline_mode = #tpu.pipeline_mode<synchronous>, transform_indices = @transform_2, window_bounds = array<i64: 1, 128>}, {transform_indices = @transform_3, window_bounds = array<i64: 1, 256, 128>}]} {
    %c16_i32 = arith.constant 16 : i32
    %0 = arith.muli %arg1, %c16_i32 : i32
    %1 = tpu.assume_multiple %0, 8 : i32
    %c0_i32 = arith.constant 0 : i32
    %2 = arith.addi %1, %c0_i32 : i32
    %c0 = arith.constant 0 : index
    %3 = arith.index_cast %2 : i32 to index
    %c0_0 = arith.constant 0 : index
    %c0_1 = arith.constant 0 : index
    %4 = vector.load %arg2[%c0, %3, %c0_0, %c0_1] : memref<1x18x18x4xbf16, #tpu.memory_space<vmem>>, vector<1x16x16x4xbf16>
    %5 = vector.shape_cast %4 : vector<1x16x16x4xbf16> to vector<16x16x4xbf16>
    %c0_i32_2 = arith.constant 0 : i32
    %6 = arith.addi %1, %c0_i32_2 : i32
    %c0_3 = arith.constant 0 : index
    %7 = arith.index_cast %6 : i32 to index
    %c1 = arith.constant 1 : index
    %c0_4 = arith.constant 0 : index
    %8 = vector.load %arg2[%c0_3, %7, %c1, %c0_4] : memref<1x18x18x4xbf16, #tpu.memory_space<vmem>>, vector<1x16x16x4xbf16>
    %9 = vector.shape_cast %8 : vector<1x16x16x4xbf16> to vector<16x16x4xbf16>
    %c0_i32_5 = arith.constant 0 : i32
    %10 = arith.addi %1, %c0_i32_5 : i32
    %c0_6 = arith.constant 0 : index
    %11 = arith.index_cast %10 : i32 to index
    %c2 = arith.constant 2 : index
    %c0_7 = arith.constant 0 : index
    %12 = vector.load %arg2[%c0_6, %11, %c2, %c0_7] : memref<1x18x18x4xbf16, #tpu.memory_space<vmem>>, vector<1x16x16x4xbf16>
    %13 = vector.shape_cast %12 : vector<1x16x16x4xbf16> to vector<16x16x4xbf16>
    %14 = tpu.concatenate %5, %9, %13 in 2 : vector<16x16x4xbf16>, vector<16x16x4xbf16>, vector<16x16x4xbf16> -> vector<16x16x12xbf16>
    %15 = vector.shape_cast %14 : vector<16x16x12xbf16> to vector<256x12xbf16>
    %c0_8 = arith.constant 0 : index
    %c0_9 = arith.constant 0 : index
    %c0_10 = arith.constant 0 : index
    %16 = vector.load %arg3[%c0_8, %c0_9, %c0_10] : memref<3x12x128xbf16, #tpu.memory_space<vmem>>, vector<1x12x128xbf16>
    %17 = vector.shape_cast %16 : vector<1x12x128xbf16> to vector<12x128xbf16>
    %cst = arith.constant dense<0.000000e+00> : vector<256x128xf32>
    %18 = tpu.matmul %15, %17, %cst {dimension_numbers = #tpu.dot_dimension_numbers<[1], [0], [0], [1], [0, 0, 1, 1], [], []>} : vector<256x12xbf16>, vector<12x128xbf16>, vector<256x128xf32> -> vector<256x128xf32>
    %c0_11 = arith.constant 0 : index
    %c0_12 = arith.constant 0 : index
    %19 = vector.load %arg4[%c0_11, %c0_12] : memref<1x128xf32, #tpu.memory_space<vmem>>, vector<1x128xf32>
    %20 = vector.broadcast %19 : vector<1x128xf32> to vector<256x128xf32>
    %21 = arith.addf %18, %20 : vector<256x128xf32>
    %c0_13 = arith.constant 0 : index
    %c0_14 = arith.constant 0 : index
    %22 = vector.load %arg6[%c0_13, %c0_14] : memref<256x128xf32, #tpu.memory_space<vmem>>, vector<256x128xf32>
    tpu.vector_store %arg6[%c0_13, %c0_14], %21 {strides = array<i32>} : memref<256x128xf32, #tpu.memory_space<vmem>>, vector<256x128xf32>,
    %c1_i32 = arith.constant 1 : i32
    %23 = arith.addi %1, %c1_i32 : i32
    %c0_15 = arith.constant 0 : index
    %24 = arith.index_cast %23 : i32 to index
    %c0_16 = arith.constant 0 : index
    %c0_17 = arith.constant 0 : index
    %25 = vector.load %arg2[%c0_15, %24, %c0_16, %c0_17] : memref<1x18x18x4xbf16, #tpu.memory_space<vmem>>, vector<1x16x16x4xbf16>
    %26 = vector.shape_cast %25 : vector<1x16x16x4xbf16> to vector<16x16x4xbf16>
    %c1_i32_18 = arith.constant 1 : i32
    %27 = arith.addi %1, %c1_i32_18 : i32
    %c0_19 = arith.constant 0 : index
    %28 = arith.index_cast %27 : i32 to index
    %c1_20 = arith.constant 1 : index
    %c0_21 = arith.constant 0 : index
    %29 = vector.load %arg2[%c0_19, %28, %c1_20, %c0_21] : memref<1x18x18x4xbf16, #tpu.memory_space<vmem>>, vector<1x16x16x4xbf16>
    %30 = vector.shape_cast %29 : vector<1x16x16x4xbf16> to vector<16x16x4xbf16>
    %c1_i32_22 = arith.constant 1 : i32
    %31 = arith.addi %1, %c1_i32_22 : i32
    %c0_23 = arith.constant 0 : index
    %32 = arith.index_cast %31 : i32 to index
    %c2_24 = arith.constant 2 : index
    %c0_25 = arith.constant 0 : index
    %33 = vector.load %arg2[%c0_23, %32, %c2_24, %c0_25] : memref<1x18x18x4xbf16, #tpu.memory_space<vmem>>, vector<1x16x16x4xbf16>
    %34 = vector.shape_cast %33 : vector<1x16x16x4xbf16> to vector<16x16x4xbf16>
    %35 = tpu.concatenate %26, %30, %34 in 2 : vector<16x16x4xbf16>, vector<16x16x4xbf16>, vector<16x16x4xbf16> -> vector<16x16x12xbf16>
    %36 = vector.shape_cast %35 : vector<16x16x12xbf16> to vector<256x12xbf16>
    %c1_26 = arith.constant 1 : index
    %c0_27 = arith.constant 0 : index
    %c0_28 = arith.constant 0 : index
    %37 = vector.load %arg3[%c1_26, %c0_27, %c0_28] : memref<3x12x128xbf16, #tpu.memory_space<vmem>>, vector<1x12x128xbf16>
    %38 = vector.shape_cast %37 : vector<1x12x128xbf16> to vector<12x128xbf16>
    %cst_29 = arith.constant dense<0.000000e+00> : vector<256x128xf32>
    %39 = tpu.matmul %36, %38, %cst_29 {dimension_numbers = #tpu.dot_dimension_numbers<[1], [0], [0], [1], [0, 0, 1, 1], [], []>} : vector<256x12xbf16>, vector<12x128xbf16>, vector<256x128xf32> -> vector<256x128xf32>
    %c0_30 = arith.constant 0 : index
    %c0_31 = arith.constant 0 : index
    %40 = vector.load %arg6[%c0_30, %c0_31] : memref<256x128xf32, #tpu.memory_space<vmem>>, vector<256x128xf32>
    %41 = arith.addf %40, %39 : vector<256x128xf32>
    %c0_32 = arith.constant 0 : index
    %c0_33 = arith.constant 0 : index
    %42 = vector.load %arg6[%c0_32, %c0_33] : memref<256x128xf32, #tpu.memory_space<vmem>>, vector<256x128xf32>
    tpu.vector_store %arg6[%c0_32, %c0_33], %41 {strides = array<i32>} : memref<256x128xf32, #tpu.memory_space<vmem>>, vector<256x128xf32>,
    %c2_i32 = arith.constant 2 : i32
    %43 = arith.addi %1, %c2_i32 : i32
    %c0_34 = arith.constant 0 : index
    %44 = arith.index_cast %43 : i32 to index
    %c0_35 = arith.constant 0 : index
    %c0_36 = arith.constant 0 : index
    %45 = vector.load %arg2[%c0_34, %44, %c0_35, %c0_36] : memref<1x18x18x4xbf16, #tpu.memory_space<vmem>>, vector<1x16x16x4xbf16>
    %46 = vector.shape_cast %45 : vector<1x16x16x4xbf16> to vector<16x16x4xbf16>
    %c2_i32_37 = arith.constant 2 : i32
    %47 = arith.addi %1, %c2_i32_37 : i32
    %c0_38 = arith.constant 0 : index
    %48 = arith.index_cast %47 : i32 to index
    %c1_39 = arith.constant 1 : index
    %c0_40 = arith.constant 0 : index
    %49 = vector.load %arg2[%c0_38, %48, %c1_39, %c0_40] : memref<1x18x18x4xbf16, #tpu.memory_space<vmem>>, vector<1x16x16x4xbf16>
    %50 = vector.shape_cast %49 : vector<1x16x16x4xbf16> to vector<16x16x4xbf16>
    %c2_i32_41 = arith.constant 2 : i32
    %51 = arith.addi %1, %c2_i32_41 : i32
    %c0_42 = arith.constant 0 : index
    %52 = arith.index_cast %51 : i32 to index
    %c2_43 = arith.constant 2 : index
    %c0_44 = arith.constant 0 : index
    %53 = vector.load %arg2[%c0_42, %52, %c2_43, %c0_44] : memref<1x18x18x4xbf16, #tpu.memory_space<vmem>>, vector<1x16x16x4xbf16>
    %54 = vector.shape_cast %53 : vector<1x16x16x4xbf16> to vector<16x16x4xbf16>
    %55 = tpu.concatenate %46, %50, %54 in 2 : vector<16x16x4xbf16>, vector<16x16x4xbf16>, vector<16x16x4xbf16> -> vector<16x16x12xbf16>
    %56 = vector.shape_cast %55 : vector<16x16x12xbf16> to vector<256x12xbf16>
    %c2_45 = arith.constant 2 : index
    %c0_46 = arith.constant 0 : index
    %c0_47 = arith.constant 0 : index
    %57 = vector.load %arg3[%c2_45, %c0_46, %c0_47] : memref<3x12x128xbf16, #tpu.memory_space<vmem>>, vector<1x12x128xbf16>
    %58 = vector.shape_cast %57 : vector<1x12x128xbf16> to vector<12x128xbf16>
    %cst_48 = arith.constant dense<0.000000e+00> : vector<256x128xf32>
    %59 = tpu.matmul %56, %58, %cst_48 {dimension_numbers = #tpu.dot_dimension_numbers<[1], [0], [0], [1], [0, 0, 1, 1], [], []>} : vector<256x12xbf16>, vector<12x128xbf16>, vector<256x128xf32> -> vector<256x128xf32>
    %c0_49 = arith.constant 0 : index
    %c0_50 = arith.constant 0 : index
    %60 = vector.load %arg6[%c0_49, %c0_50] : memref<256x128xf32, #tpu.memory_space<vmem>>, vector<256x128xf32>
    %61 = arith.addf %60, %59 : vector<256x128xf32>
    %c0_51 = arith.constant 0 : index
    %c0_52 = arith.constant 0 : index
    %62 = vector.load %arg6[%c0_51, %c0_52] : memref<256x128xf32, #tpu.memory_space<vmem>>, vector<256x128xf32>
    tpu.vector_store %arg6[%c0_51, %c0_52], %61 {strides = array<i32>} : memref<256x128xf32, #tpu.memory_space<vmem>>, vector<256x128xf32>,
    %c0_53 = arith.constant 0 : index
    %c0_54 = arith.constant 0 : index
    %63 = vector.load %arg6[%c0_53, %c0_54] : memref<256x128xf32, #tpu.memory_space<vmem>>, vector<256x128xf32>
    %64 = arith.truncf %63 : vector<256x128xf32> to vector<256x128xbf16>
    %c0_55 = arith.constant 0 : index
    %c0_56 = arith.constant 0 : index
    %c0_57 = arith.constant 0 : index
    %65 = vector.load %arg5[%c0_55, %c0_56, %c0_57] : memref<1x256x128xbf16, #tpu.memory_space<vmem>>, vector<1x256x128xbf16>
    %66 = vector.shape_cast %65 : vector<1x256x128xbf16> to vector<256x128xbf16>
    %67 = vector.shape_cast %64 : vector<256x128xbf16> to vector<1x256x128xbf16>
    tpu.vector_store %arg5[%c0_55, %c0_56, %c0_57], %67 {strides = array<i32>} : memref<1x256x128xbf16, #tpu.memory_space<vmem>>, vector<1x256x128xbf16>,
    return
  }
  func.func @transform_0(%arg0: i32, %arg1: i32) -> (i32, i32, i32, i32) {
    %c0_i32 = arith.constant 0 : i32
    %c0_i32_0 = arith.constant 0 : i32
    %c0_i32_1 = arith.constant 0 : i32
    %c0_i32_2 = arith.constant 0 : i32
    return %arg0, %c0_i32, %c0_i32_0, %c0_i32_1 : i32, i32, i32, i32
  }
  func.func @transform_1(%arg0: i32, %arg1: i32) -> (i32, i32, i32) {
    %c0_i32 = arith.constant 0 : i32
    %c0_i32_0 = arith.constant 0 : i32
    %c0_i32_1 = arith.constant 0 : i32
    %c0_i32_2 = arith.constant 0 : i32
    return %c0_i32, %c0_i32_0, %c0_i32_1 : i32, i32, i32
  }
  func.func @transform_2(%arg0: i32, %arg1: i32) -> (i32, i32) {
    %c0_i32 = arith.constant 0 : i32
    %c0_i32_0 = arith.constant 0 : i32
    %c0_i32_1 = arith.constant 0 : i32
    return %c0_i32, %c0_i32_0 : i32, i32
  }
  func.func @transform_3(%arg0: i32, %arg1: i32) -> (i32, i32, i32) {
    %c0_i32 = arith.constant 0 : i32
    %c0_i32_0 = arith.constant 0 : i32
    return %arg0, %arg1, %c0_i32 : i32, i32, i32
  }
}

</mosaic_0001>

<bundles_post_ra>
// kernel: tpu_custom_call.1
= control target key start
LH: loop header
LB: loop body
LE: loop exit
PB: predicated region body
PF: predicated region fallthrough
CT: control target
= control target key end

     0   :  { %8 = vsyncpa [#allocation4], 0  ;;  %s4727_s0 = inlined_call_operand.vmem [shape: bf16[2,18,18,4], index: 0, kind: input, shape index: {}]   ;;  %s4728_s1 = inlined_call_operand.vmem [shape: bf16[3,12,128], index: 1, kind: input, shape index: {}]   ;;  %s4729_s2 = inlined_call_operand.vmem [shape: f32[1,128], index: 2, kind: input, shape index: {}]   ;;  %s4730_s3 = inlined_call_operand.hbm [shape: bf16[2,256,128], index: 3, kind: output, shape index: {}]  }
   0x1   :  { %10 = vsyncpa [#allocation4 + $0x1], 0  ;;  %s3586_s12 = smov 0   ;;  %s3588_s13 = smov 0  }
   0x2   :  { %s3590_s14 = smov 0   ;;  %s3592_s15 = smov 0  }
   0x3   :  { %s3594_s16 = smov 0   ;;  %s3596_s17 = smov 0  }
   0x4 LB: > { %s2847_s18 = sadd.s32 4294967295, %s3561_s17   ;;  %s2848_s19 = sadd.s32 4294967294, %s3561_s17   ;;  %s3561_s17 = sphi %s3596_s17, %s16_s17   ;;  %s3557_s16 = sphi %s3594_s16, %s4737_s16   ;;  %s3553_s15 = sphi %s3592_s15, %s4736_s15   ;;  %s3549_s14 = sphi %s3590_s14, %s4735_s14   ;;  %s3545_s13 = sphi %s3588_s13, %s4734_s13   ;;  %s3541_s12 = sphi %s3586_s12, %s4733_s12  }
   0x5   : > { %s28_s20 = sadd.s32 1, %s3557_s16  ;;  %s105_s21 = sadd.s32 1, %s3549_s14 }
   0x6   : > { %p30_p0 = scmp.ge.s32.totalorder %s28_s20, 2  ;;  %p115_p1 = scmp.ne.s32.totalorder %s3549_s14, %s3545_s13 }
   0x7   : > { %p116_p2 = scmp.eq.s32.totalorder %s2847_s18, 1  ;;  %p121_p3 = scmp.ne.s32.totalorder %s3545_s13, %s3541_s12 }
   0x8   : > { %s4739_s20 = smov (%p30_p0, %s28_s20), 0  ;;  %p122_p5 = scmp.eq.s32.totalorder %s2848_s19, 1 }
   0x9   : > { %p3626_p4 = por %p116_p2, %p115_p1  ;;  %s100_s23 = ssub.s32 %s3557_s16, %s4739_s20 }
   0xa   : > { %p2851_p6 = scmp.ge.s32.totalorder %s3561_s17, 1  ;;  %p103_p7 = scmp.eq.s32.totalorder %s100_s23, 0 }
   0xb   : > { %p3633_p8 = por %p122_p5, %p121_p3  ;;  %p154_p9 = scmp.lt.s32.totalorder %s3561_s17, 3 }
   0xc   : > { %s3639_s25 = scalar_select %p103_p7, %s3549_s14, %s105_s21  }
   0xd   : > { %p155_p10 = pnand %p2851_p6, %p154_p9 }
   0xe   : > { %p178_p11 = scmp.lt.s32.totalorder (!%p155_p10), %s3553_s15, 1  ;;  %s3563_s4 = smov (!%p155_p10), 8  }
   0xf   : > { %158 = sbr.rel (%p155_p10) target bundleno = 545 (0x221), region = 32  ;;  %s3564_s5 = smov (!%p155_p10), 4  }
  0x14   : > { %s179_s26 = scalar_select %p178_p11, %s3553_s15, 1  ;;  %vm654_vm0 = vcmask 1046528   ;;  %vm381_vm1 = vsmask.f32 7424  ;;  %vm845_vm2 = vcmask 1045504   ;;  %vm735_vm3 = vcmask 31744  }
  0x15   : > { %vm768_vm4 = vcmask 64512   ;;  %vm812_vm5 = vcmask 97280  }
  0x16   : > { %s3344_s27 = smul.u32 216, %s179_s26 }
  0x18   : > { %s3646_s30 = scalar_lea.vmem %s4727_s0, %s3344_s27  ;;  %s3500_s27 = scalar_lea.hbm %s4730_s3, 256 }
  0x19   : > { %v3256_v0 = vld [vmem:[%s3646_s30 + $0x90] sm:$0xf0]  ;;  %v233_v1 = vld [vmem:[%s3646_s30 + $0x98] sm:$0x1]  ;;  %v3257_v2 = vld [vmem:[%s3646_s30 + $0x90] sm:$0xe] }
  0x1a   : > { %v361_v3 = vunpack.c.l.b16 %v233_v1  ;;  %v3258_v4 = vor.u32 %v3257_v2, %v3256_v0  ;;  %v3652_v5 = vld [vmem:[%s3646_s30 + $0x90] sm:$0xff]   ;;  %v3302_v6 = vld [vmem:[%s3646_s30 + $0x18] sm:$0xf0]  ;;  %v2992_v7 = vld [vmem:[%s3646_s30 + $0x20] sm:$0x1] }
  0x1b   : > { %v527_v8 = vshrl.u32 %v3652_v5, 16  ;;  %v529_v9 = vshll.u32 %v3652_v5, 16  ;;  %v3303_v10 = vld [vmem:[%s3646_s30 + $0x18] sm:$0xe]  ;;  %v1974_v11 = vunpack.c.l.b16 %v2992_v7  ;;  %v3238_v17 = vld [vmem:[%s3646_s30] sm:$0xf0] }
  0x1c   : > { %v3294_v12 = vld [vmem:[%s3646_s30 + $0x18] sm:$0xff]   ;;  %v377_v13 = vpack.c.b16 %v361_v3, %v361_v3  ;;  %v691_v14 = vrot.slane %v3258_v4, 1  ;;  %v3304_v15 = vor.u32 %v3303_v10, %v3302_v6  ;;  %v221_v18 = vld [vmem:[%s3646_s30 + $0x8] sm:$0x1]  ;;  %v3239_v22 = vld [vmem:[%s3646_s30] sm:$0xe] }
  0x1d   : > { %v2007_v16 = vshrl.u32 %v3294_v12, 16  ;;  %v531_v19 = vrot.slane %v529_v9, 1  ;;  %v1990_v20 = vpack.c.b16 %v1974_v11, %v1974_v11  ;;  %v2009_v21 = vshll.u32 %v3294_v12, 16  ;;  %v3664_v27 = vld [vmem:[%s3646_s30 + $0xc] sm:$0xff]   ;;  %v2906_v32 = vld [vmem:[%s3646_s30 + $0x14] sm:$0x1] }
  0x1e   : > { %v349_v23 = vunpack.c.l.b16 %v221_v18  ;;  %v692_v24 = vrot.slane %v377_v13, 1  ;;  %v534_v25 = vshll.u32 %v377_v13, 16  ;;  %v3240_v26 = vor.u32 %v3239_v22, %v3238_v17  ;;  %v3411_v28 = vld [vmem:[%s3646_s30 + $0xc] sm:$0xf0]  ;;  %v3412_v37 = vld [vmem:[%s3646_s30 + $0xc] sm:$0xe] }
  0x1f   : > { %v532_v29 = vor.u32 %v531_v19, %v527_v8  ;;  %v2011_v30 = vrot.slane %v2009_v21, 1  ;;  %v2014_v31 = vshll.u32 %v1990_v20, 16  ;;  %v3671_v38 = vld [vmem:[%s3646_s30] sm:$0xff]   ;;  %v2278_v39 = vrot.slane %v3304_v15, 1  ;;  %v3693_v59 = vld [vmem:[%s3646_s30 + $0x24] sm:$0xf0] }
  0x20   : > { %v693_v33 = vsel %vm654_vm0, %v691_v14, %v692_v24  ;;  %v536_v34 = vrot.slane %v534_v25, 1  ;;  %v365_v35 = vpack.c.b16 %v349_v23, %v349_v23  ;;  %v655_v36 = vrot.slane %v3240_v26, 1  ;;  %v3683_v53 = vld [vmem:[%s3646_s30 + $0x9c] sm:$0xff]   ;;  %v234_v57 = vld [vmem:[%s3646_s30 + $0xa4] sm:$0x1]  ;;  %v3702_v7 = vld [vmem:[%s3646_s30 + $0xc] sm:$0xff]  }
  0x21   : > { %727 = vrot.lane.b32.xlu1 %v693_v33, %s3563_s4  ;;  %v2279_v40 = vrot.slane %v1990_v20, 1  ;;  %v3674_v41 = vor.u32 %v2011_v30, %v2007_v16  ;;  %v1134_v44 = vunpack.c.l.b16 %v2906_v32  ;;  %v2016_v45 = vrot.slane %v2014_v31, 1  ;;  %v3536_v54 = vld [vmem:[%s3646_s30 + $0x9c] sm:$0xf0]  ;;  %v3690_v58 = vld [vmem:[%s3646_s30 + $0x24] sm:$0xff]  }
  0x22   : > { %v537_v42 = vsel %vm381_vm1, %v532_v29, %v536_v34  ;;  %v656_v43 = vrot.slane %v365_v35, 1  ;;  %v383_v46 = vshrl.u32 %v3671_v38, 16  ;;  %v385_v47 = vshll.u32 %v3671_v38, 16  ;;  %v3537_v63 = vld [vmem:[%s3646_s30 + $0x9c] sm:$0xe] }
  0x23   : > { %598 = vrot.lane.b32.xlu0 %v537_v42, %s3564_s5  ;;  %v1150_v49 = vpack.c.b16 %v1134_v44, %v1134_v44  ;;  %v390_v50 = vshll.u32 %v365_v35, 16  ;;  %v3413_v51 = vor.u32 %v3412_v37, %v3411_v28  ;;  %v2280_v55 = vsel %vm654_vm0, %v2278_v39, %v2279_v40  ;;  %v2993_v0 = vld [vmem:[%s3646_s30 + $0x2c] sm:$0x1]  ;;  %v3414_v8 = vld [vmem:[%s3646_s30 + $0xc] sm:$0xf0] }
  0x24   : > { %v657_v48 = vsel %vm654_vm0, %v655_v36, %v656_v43  ;;  %v387_v52 = vrot.slane %v385_v47, 1  ;;  %v1169_v56 = vshll.u32 %v3664_v27, 16  ;;  %v2017_v60 = vsel %vm381_vm1, %v3674_v41, %v2016_v45  ;;  %v222_v15 = vld [vmem:[%s3646_s30 + $0x14] sm:$0x1]  ;;  %v3415_v20 = vld [vmem:[%s3646_s30 + $0xc] sm:$0xe] }
  0x25   : > { %703 = vrot.lane.b32.xlu2 %v657_v48, %s3563_s4  ;;  %v392_v62 = vrot.slane %v390_v50, 1  ;;  %v1167_v1 = vshrl.u32 %v3664_v27, 16  ;;  %v1174_v3 = vshll.u32 %v1150_v49, 16  ;;  %v1438_v4 = vrot.slane %v3413_v51, 1  ;;  %v235_v31 = vld [vmem:[%s3646_s30 + $0xb0] sm:$0x1] }
  0x26   : > { %v388_v61 = vor.u32 %v387_v52, %v383_v46  ;;  %v1171_v2 = vrot.slane %v1169_v56, 1  ;;  %v1439_v6 = vrot.slane %v1150_v49, 1  ;;  %v362_v10 = vunpack.c.l.b16 %v234_v57  ;;  %v3418_v43 = vld [vmem:[%s3646_s30 + $0x24] sm:$0xe]  ;;  %v3237_v45 = vld [vmem:[%s3646_s30 + $0xa8] sm:$0xff]  }
  0x27   : > { %v1975_v11 = vunpack.c.l.b16 %v2993_v0  ;;  %v1176_v13 = vrot.slane %v1174_v3, 1  ;;  %v2021_v16 = vshll.u32 %v3690_v58, 16  ;;  %v3538_v19 = vor.u32 %v3537_v63, %v3536_v54  ;;  %v2907_v46 = vld [vmem:[%s3646_s30 + $0x20] sm:$0x1]  ;;  %v3270_v0 = vld [vmem:[%s3646_s30 + $0x18] sm:$0xf0] }
  0x28   : > { %v393_v9 = vsel %vm381_vm1, %v388_v61, %v392_v62  ;;  %v1172_v12 = vor.u32 %v1171_v2, %v1167_v1  ;;  %v1440_v17 = vsel %vm654_vm0, %v1438_v4, %v1439_v6  ;;  %v378_v18 = vpack.c.b16 %v362_v10, %v362_v10  ;;  %v3271_v1 = vld [vmem:[%s3646_s30 + $0x18] sm:$0xe] }
  0x29   : > { %2326 = vrot.lane.b32.xlu1 %v2280_v55, %s3563_s4  ;;  %v3707_v14 = vpack.c.b16 %v1975_v11, %v1975_v11  ;;  %v350_v22 = vunpack.c.l.b16 %v222_v15  ;;  %v2019_v24 = vshrl.u32 %v3690_v58, 16  ;;  %v2023_v25 = vrot.slane %v2021_v16, 1  ;;  %v2994_v11 = vld [vmem:[%s3646_s30 + $0x38] sm:$0x1] }
  0x2a   : > { %v1177_v23 = vsel %vm381_vm1, %v1172_v12, %v1176_v13  ;;  %v694_v26 = vrot.slane %v3538_v19, 1  ;;  %v695_v28 = vrot.slane %v378_v18, 1  ;;  %v397_v33 = vshll.u32 %v3702_v7, 16  ;;  %v3746_v13 = vld [vmem:[%s3646_s30 + $0x24] sm:$0xf0] }
  0x2b   : > { %2198 = vrot.lane.b32.xlu0 %v2017_v60, %s3564_s5  ;;  %v2026_v21 = vshll.u32 %v3707_v14, 16  ;;  %v366_v30 = vpack.c.b16 %v350_v22, %v350_v22  ;;  %v2024_v32 = vor.u32 %v2023_v25, %v2019_v24  ;;  %v539_v34 = vshrl.u32 %v3683_v53, 16  ;;  %v3306_v22 = vld [vmem:[%s3646_s30 + $0x30] sm:$0xe]  ;;  %v2908_v25 = vld [vmem:[%s3646_s30 + $0x2c] sm:$0x1] }
  0x2c   : > { %v541_v35 = vshll.u32 %v3683_v53, 16  ;;  %v3416_v36 = vor.u32 %v3415_v20, %v3414_v8  ;;  %v546_v37 = vshll.u32 %v378_v18, 16  ;;  %v696_v39 = vsel %vm654_vm0, %v694_v26, %v695_v28  ;;  %v3295_v18 = vld [vmem:[%s3646_s30 + $0x30] sm:$0xff]   ;;  %v3259_v26 = vld [vmem:[%s3646_s30 + $0xa8] sm:$0xf0] }
  0x2d   : > { %574 = vrot.lane.b32.xlu2 %v393_v9, %s3564_s5  ;;  %v2028_v29 = vrot.slane %v2026_v21, 1  ;;  %v363_v40 = vunpack.c.l.b16 %v235_v31  ;;  %v402_v44 = vshll.u32 %v366_v30, 16  ;;  %v395_v49 = vshrl.u32 %v3702_v7, 16  ;;  %v3305_v21 = vld [vmem:[%s3646_s30 + $0x30] sm:$0xf0] }
  0x2e   : > { %v543_v42 = vrot.slane %v541_v35, 1  ;;  %v548_v47 = vrot.slane %v546_v37, 1  ;;  %v399_v50 = vrot.slane %v397_v33, 1  ;;  %v658_v52 = vrot.slane %v3416_v36, 1  ;;  %v3260_v28 = vld [vmem:[%s3646_s30 + $0xa8] sm:$0xe] }
  0x2f   : > { %v2029_v48 = vsel %vm381_vm1, %v2024_v32, %v2028_v29  ;;  %v659_v54 = vrot.slane %v366_v30, 1  ;;  %v3730_v55 = vpack.c.b16 %v363_v40, %v363_v40  ;;  %v553_v56 = vshll.u32 %v3237_v45, 16  ;;  %v3764_v35 = vld [vmem:[%s3646_s30 + $0x3c] sm:$0xff]  }
  0x30   : > { %v544_v51 = vor.u32 %v543_v42, %v539_v34  ;;  %v1135_v57 = vunpack.c.l.b16 %v2907_v46  ;;  %v3419_v61 = vor.u32 %v3418_v43, %v3693_v59  ;;  %v400_v62 = vor.u32 %v399_v50, %v395_v49  ;;  %v3743_v59 = vld [vmem:[%s3646_s30 + $0x24] sm:$0xff]   ;;  %v3767_v36 = vld [vmem:[%s3646_s30 + $0x3c] sm:$0xf0]  ;;  %v3778_v49 = vld [vmem:[%s3646_s30 + $0xb4] sm:$0xf0] }
  0x31   : > { %1486 = vrot.lane.b32.xlu1 %v1440_v17, %s3563_s4  ;;  %v404_v63 = vrot.slane %v402_v44, 1  ;;  %v2282_v2 = vrot.slane %v3707_v14, 1  ;;  %v551_v3 = vshrl.u32 %v3237_v45, 16  ;;  %v660_v6 = vsel %vm654_vm0, %v658_v52, %v659_v54  ;;  %v223_v40 = vld [vmem:[%s3646_s30 + $0x20] sm:$0x1] }
  0x32   : > { %v549_v60 = vsel %vm381_vm1, %v544_v51, %v548_v47  ;;  %v2281_v4 = vrot.slane %v3419_v61, 1  ;;  %v555_v8 = vrot.slane %v553_v56, 1  ;;  %v558_v9 = vshll.u32 %v3730_v55, 16  ;;  %v2995_v54 = vld [vmem:[%s3646_s30 + $0x44] sm:$0x1] }
  0x33   : > { %1358 = vrot.lane.b32.xlu0 %v1177_v23, %s3564_s5  ;;  %v1151_v10 = vpack.c.b16 %v1135_v57, %v1135_v57  ;;  %v3272_v12 = vor.u32 %v3271_v1, %v3270_v0  ;;  %v405_v14 = vsel %vm381_vm1, %v400_v62, %v404_v63  ;;  %v1976_v17 = vunpack.c.l.b16 %v2994_v11  ;;  %v3242_v61 = vld [vmem:[%s3646_s30 + $0x18] sm:$0xe]  ;;  %v236_v62 = vld [vmem:[%s3646_s30 + $0xbc] sm:$0x1]  ;;  %v3799_v11 = vld [vmem:[%s3646_s30 + $0x24] sm:$0xf0] }
  0x34   : > { %v2283_v15 = vsel %vm654_vm0, %v2281_v4, %v2282_v2  ;;  %v3752_v19 = vor.u32 %v555_v8, %v551_v3  ;;  %v560_v20 = vrot.slane %v558_v9, 1  ;;  %v2033_v30 = vshll.u32 %v3295_v18, 16 }
  0x35   : > { %600 = vrot.lane.b32.xlu2 %v549_v60, %s3564_s5  ;;  %v1186_v16 = vshll.u32 %v1151_v10, 16  ;;  %v1441_v23 = vrot.slane %v3272_v12, 1  ;;  %v1442_v24 = vrot.slane %v1151_v10, 1  ;;  %v1992_v31 = vpack.c.b16 %v1976_v17, %v1976_v17  ;;  %v3241_v60 = vld [vmem:[%s3646_s30 + $0x18] sm:$0xf0]  ;;  %v3796_v10 = vld [vmem:[%s3646_s30 + $0x24] sm:$0xff]  }
  0x36   : > { %v3307_v32 = vor.u32 %v3306_v22, %v3305_v21  ;;  %v561_v33 = vsel %vm381_vm1, %v3752_v19, %v560_v20  ;;  %v1136_v34 = vunpack.c.l.b16 %v2908_v25  ;;  %v2031_v43 = vshrl.u32 %v3295_v18, 16  ;;  %v3421_v18 = vld [vmem:[%s3646_s30 + $0x24] sm:$0xe]  ;;  %v224_v25 = vld [vmem:[%s3646_s30 + $0x2c] sm:$0x1] }
  0x37   : > { %v1188_v29 = vrot.slane %v1186_v16, 1  ;;  %v1443_v37 = vsel %vm654_vm0, %v1441_v23, %v1442_v24  ;;  %v2035_v44 = vrot.slane %v2033_v30, 1  ;;  %v2038_v45 = vshll.u32 %v1992_v31, 16 }
  0x38   : > { %v2284_v46 = vrot.slane %v3307_v32, 1  ;;  %v2285_v47 = vrot.slane %v1992_v31, 1  ;;  %v3780_v50 = vpack.c.b16 %v1136_v34, %v1136_v34  ;;  %v1193_v51 = vshll.u32 %v3743_v59, 16 }
  0x39   : > { %729 = vrot.lane.b32.xlu1 %v696_v39, %s3563_s4  ;;  %v3261_v39 = vor.u32 %v3260_v28, %v3259_v26  ;;  %v1189_v42 = vsel %vm381_vm1, %v3674_v41, %v1188_v29  ;;  %v351_v52 = vunpack.c.l.b16 %v223_v40  ;;  %v698_v57 = vrot.slane %v3730_v55, 1 }
  0x3a   : > { %v3790_v63 = vor.u32 %v2035_v44, %v2031_v43  ;;  %v2040_v0 = vrot.slane %v2038_v45, 1  ;;  %v2286_v1 = vsel %vm654_vm0, %v2284_v46, %v2285_v47  ;;  %v1977_v2 = vunpack.c.l.b16 %v2995_v54  ;;  %v3427_v47 = vld [vmem:[%s3646_s30 + $0xb4] sm:$0xe] }
  0x3b   : > { %2200 = vrot.lane.b32.xlu0 %v2029_v48, %s3564_s5  ;;  %v3775_v48 = vld [vmem:[%s3646_s30 + $0xb4] sm:$0xff]   ;;  %v697_v56 = vrot.slane %v3261_v39, 1  ;;  %v1191_v3 = vshrl.u32 %v3743_v59, 16  ;;  %v1195_v4 = vrot.slane %v1193_v51, 1  ;;  %v367_v8 = vpack.c.b16 %v351_v52, %v351_v52 }
  0x3c   : > { %v3243_v55 = vor.u32 %v3242_v61, %v3241_v60  ;;  %v364_v9 = vunpack.c.l.b16 %v236_v62  ;;  %v3805_v16 = vpack.c.b16 %v1977_v2, %v1977_v2  ;;  %v2045_v17 = vshll.u32 %v3764_v35, 16 }
  0x3d   : > { %2328 = vrot.lane.b32.xlu2 %v2283_v15, %s3563_s4  ;;  %v699_v12 = vsel %vm654_vm0, %v697_v56, %v698_v57  ;;  %v414_v15 = vshll.u32 %v367_v8, 16  ;;  %v1196_v20 = vor.u32 %v1195_v4, %v1191_v3  ;;  %v662_v23 = vrot.slane %v367_v8, 1  ;;  %v2909_v56 = vld [vmem:[%s3646_s30 + $0x38] sm:$0x1] }
  0x3e   : > { %v661_v22 = vrot.slane %v3243_v55, 1  ;;  %v3810_v24 = vpack.c.b16 %v364_v9, %v364_v9  ;;  %v565_v26 = vshll.u32 %v3775_v48, 16  ;;  %v2043_v29 = vshrl.u32 %v3764_v35, 16  ;;  %v3273_v9 = vld [vmem:[%s3646_s30 + $0x30] sm:$0xf0] }
  0x3f   : > { %v416_v28 = vrot.slane %v414_v15, 1  ;;  %v2047_v30 = vrot.slane %v2045_v17, 1  ;;  %v2050_v31 = vshll.u32 %v3805_v16, 16  ;;  %v563_v39 = vshrl.u32 %v3775_v48, 16  ;;  %v3849_v17 = vld [vmem:[%s3646_s30 + $0x9c] sm:$0xff]  }
  0x40   : > { %v663_v34 = vsel %vm654_vm0, %v661_v22, %v662_v23  ;;  %v567_v40 = vrot.slane %v565_v26, 1  ;;  %v3422_v44 = vor.u32 %v3421_v18, %v3746_v13  ;;  %v421_v52 = vshll.u32 %v3796_v10, 16  ;;  %v2996_v18 = vld [vmem:[%s3646_s30 + $0x50] sm:$0x1]  ;;  %v2918_v26 = vld [vmem:[%s3646_s30 + $0xa4] sm:$0x1] }
  0x41   : > { %705 = vrot.lane.b32.xlu1 %v660_v6, %s3563_s4  ;;  %v1198_v6 = vshll.u32 %v3780_v50, 16  ;;  %v417_v43 = vsel %vm381_vm1, %v3674_v41, %v416_v28  ;;  %v2048_v45 = vor.u32 %v2047_v30, %v2043_v29  ;;  %v2052_v46 = vrot.slane %v2050_v31, 1  ;;  %v3433_v28 = vld [vmem:[%s3646_s30 + $0x9c] sm:$0xe] }
  0x42   : > { %v568_v57 = vor.u32 %v567_v40, %v563_v39  ;;  %v1444_v41 = vrot.slane %v3422_v44, 1  ;;  %v1445_v13 = vrot.slane %v3780_v50, 1  ;;  %v419_v61 = vshrl.u32 %v3796_v10, 16  ;;  %v3430_v50 = vld [vmem:[%s3646_s30 + $0x24] sm:$0xe] }
  0x43   : > { %576 = vrot.lane.b32.xlu0 %v405_v14, %s3564_s5  ;;  %v2041_v14 = vsel %vm381_vm1, %v3790_v63, %v2040_v0  ;;  %v1200_v21 = vrot.slane %v1198_v6, 1  ;;  %v2053_v60 = vsel %vm381_vm1, %v2048_v45, %v2052_v46  ;;  %v423_v62 = vrot.slane %v421_v52, 1  ;;  %v2856_v39 = vld [vmem:[%s4728_s1] sm:$0xf]  ;;  %v3051_v40 = vld [vmem:[%s4728_s1] sm:$0x30] }
  0x44   : > { %v1446_v4 = vsel %vm654_vm0, %v1444_v41, %v1445_v13  ;;  %v3428_v6 = vor.u32 %v3427_v47, %v3778_v49  ;;  %v2288_v15 = vrot.slane %v3805_v16, 1  ;;  %v3432_v49 = vld [vmem:[%s3646_s30 + $0x9c] sm:$0xf0]  ;;  %v1978_v29 = vunpack.c.l.b16 %v2996_v18  ;;  %v3296_v16 = vld [vmem:[%s3646_s30 + $0x48] sm:$0xff]  }
  0x45   : > { %1360 = vrot.lane.b32.xlu2 %v1189_v42, %s3564_s5  ;;  %v1201_v32 = vsel %vm381_vm1, %v1196_v20, %v1200_v21  ;;  %v3424_v42 = vld [vmem:[%s3646_s30 + $0x3c] sm:$0xe]  ;;  %v424_v8 = vor.u32 %v423_v62, %v419_v61  ;;  %v701_v21 = vrot.slane %v3810_v24, 1  ;;  %v1313_v46 = vshll.u32 %v3849_v17, 16 }
  0x46   : > { %v3425_v2 = vor.u32 %v3424_v42, %v3767_v36  ;;  %v700_v20 = vrot.slane %v3428_v6, 1  ;;  %v3869_v42 = vpack.c.b16 %v1978_v29, %v1978_v29  ;;  %v2857_v47 = vor.u32 %v3051_v40, %v2856_v39  ;;  %v2919_v6 = vld [vmem:[%s3646_s30 + $0xb0] sm:$0x1]  ;;  %v3436_v29 = vld [vmem:[%s3646_s30 + $0x3c] sm:$0xe] }
  0x47   : > { %v2055_v13 = vshrl.u32 %v3296_v16, 16  ;;  %v1147_v18 = vunpack.c.l.b16 %v2919_v6 }
  0x48   : > { %v2287_v36 = vrot.slane %v3425_v2, 1  ;;  %v702_v31 = vsel %vm654_vm0, %v700_v20, %v701_v21  ;;  %v847_v41 = vsel %vm845_vm2, %v2857_v47, 0  ;;  %v3308_v20 = vld [vmem:[%s3646_s30 + $0x48] sm:$0xf0]  ;;  %v3309_v21 = vld [vmem:[%s3646_s30 + $0x48] sm:$0xe] }
  0x49   : > { %602 = vrot.lane.b32.xlu1 %v561_v33, %s3564_s5  ;;  %v352_v33 = vunpack.c.l.b16 %v224_v25  ;;  %856 = vmatpush.bf16.msra.mxu0 %v847_v41 }
  0x4a   : > { %v2289_v30 = vsel %vm654_vm0, %v2287_v36, %v2288_v15  ;;  %3341 = vmatpush.bf16.msra.mxu3 %v847_v41 }
  0x4b   : > { %1488 = vrot.lane.b32.xlu0 %v1443_v37, %s3563_s4  ;;  %v570_v37 = vshll.u32 %v3810_v24, 16  ;;  %v3827_v51 = vpack.c.b16 %v352_v33, %v352_v33 }
  0x4d   : > { %2202 = vrot.lane.b32.xlu2 %v2041_v14, %s3564_s5  ;;  %v572_v54 = vrot.slane %v570_v37, 1  ;;  %v426_v0 = vshll.u32 %v3827_v51, 16  ;;  %v1146_v37 = vunpack.c.l.b16 %v2918_v26  ;;  %v665_v45 = vrot.slane %v3827_v51, 1 }
  0x4e   : > { %v2062_v51 = vshll.u32 %v3869_v42, 16 }
  0x4f   : > { %v573_v3 = vsel %vm381_vm1, %v568_v57, %v572_v54  ;;  %v428_v55 = vrot.slane %v426_v0, 1  ;;  %v3434_v57 = vor.u32 %v3433_v28, %v3432_v49  ;;  %v1311_v0 = vshrl.u32 %v3849_v17, 16 }
  0x50   : > { %v2064_v36 = vrot.slane %v2062_v51, 1 }
  0x51   : > { %2330 = vrot.lane.b32.xlu1 %v2286_v1, %s3563_s4  ;;  %v1137_v1 = vunpack.c.l.b16 %v2909_v56  ;;  %v429_v23 = vsel %vm381_vm1, %v424_v8, %v428_v55  ;;  %v1162_v56 = vpack.c.b16 %v1146_v37, %v1146_v37  ;;  %v3435_v8 = vld [vmem:[%s3646_s30 + $0x3c] sm:$0xf0]  ;;  %v3244_v55 = vld [vmem:[%s3646_s30 + $0x30] sm:$0xf0] }
  0x53   : > { %731 = vrot.lane.b32.xlu0 %v699_v12, %s3563_s4  ;;  %v3274_v12 = vld [vmem:[%s3646_s30 + $0x30] sm:$0xe]  ;;  %v1153_v14 = vpack.c.b16 %v1137_v1, %v1137_v1  ;;  %v1315_v1 = vrot.slane %v1313_v46, 1  ;;  %v1318_v2 = vshll.u32 %v1162_v56, 16  ;;  %v2291_v46 = vrot.slane %v3869_v42, 1 }
  0x54   : > { %v3275_v22 = vor.u32 %v3274_v12, %v3273_v9  ;;  %v3245_v9 = vld [vmem:[%s3646_s30 + $0x30] sm:$0xe] }
  0x55   : > { %578 = vrot.lane.b32.xlu2 %v417_v43, %s3564_s5  ;;  %v1210_v25 = vshll.u32 %v1153_v14, 16  ;;  %v2057_v43 = vshll.u32 %v3296_v16, 16  ;;  %v1316_v15 = vor.u32 %v1315_v1, %v1311_v0  ;;  %v1320_v49 = vrot.slane %v1318_v2, 1  ;;  %v2942_v2 = vld [vmem:[%s4728_s1 + $0x8] sm:$0xf] }
  0x56   : > { %v1447_v33 = vrot.slane %v3275_v22, 1  ;;  %v3310_v16 = vor.u32 %v3309_v21, %v3308_v20 }
  0x57   : > { %v1212_v24 = vrot.slane %v1210_v25, 1  ;;  %v2910_v25 = vld [vmem:[%s3646_s30 + $0x44] sm:$0x1] }
  0x59   : > { %1362 = vrot.lane.b32.xlu1 %v1201_v32, %s3564_s5  ;;  %v3431_v32 = vor.u32 %v3430_v50, %v3799_v11  ;;  %v225_v11 = vld [vmem:[%s3646_s30 + $0x38] sm:$0x1]  ;;  %v1213_v54 = vsel %vm381_vm1, %v3790_v63, %v1212_v24  ;;  %v3885_v50 = vld [vmem:[%s3646_s30 + $0x3c] sm:$0xff]  }
  0x5a   : > { %v353_v61 = vunpack.c.l.b16 %v225_v11  ;;  %v3438_v11 = vld [vmem:[%s3646_s30 + $0x54] sm:$0xf0]  ;;  %v1215_v51 = vshrl.u32 %v3885_v50, 16 }
  0x5b   : > { %707 = vrot.lane.b32.xlu0 %v663_v34, %s3563_s4  ;;  %v1448_v34 = vrot.slane %v1153_v14, 1  ;;  %v664_v44 = vrot.slane %v3431_v32, 1  ;;  %v1138_v32 = vunpack.c.l.b16 %v2910_v25 }
  0x5c   : > { %v369_v12 = vpack.c.b16 %v353_v61, %v353_v61 }
  0x5d   : > { %1490 = vrot.lane.b32.xlu2 %v1446_v4, %s3563_s4  ;;  %v1449_v52 = vsel %vm654_vm0, %v1447_v33, %v1448_v34  ;;  %v666_v62 = vsel %vm654_vm0, %v664_v44, %v665_v45  ;;  %v1475_v4 = vrot.slane %v1162_v56, 1  ;;  %v3028_v33 = vld [vmem:[%s4728_s1 + $0x10] sm:$0xf]  ;;  %v3053_v34 = vld [vmem:[%s4728_s1 + $0x10] sm:$0x30]  ;;  %v1217_v44 = vshll.u32 %v3885_v50, 16 }
  0x5e   : > { %v438_v26 = vshll.u32 %v369_v12, 16  ;;  %v668_v37 = vrot.slane %v369_v12, 1  ;;  %v3029_v39 = vor.u32 %v3053_v34, %v3028_v33  ;;  %v2290_v45 = vrot.slane %v3310_v16, 1  ;;  %v226_v16 = vld [vmem:[%s3646_s30 + $0x44] sm:$0x1]  ;;  %v3960_v34 = vld [vmem:[%s3646_s30 + $0xb4] sm:$0xff]  }
  0x5f   : > { %v1219_v42 = vrot.slane %v1217_v44, 1  ;;  %v3442_v33 = vld [vmem:[%s3646_s30 + $0x3c] sm:$0xe] }
  0x60   : > { %v440_v40 = vrot.slane %v438_v26, 1  ;;  %v3920_v47 = vsel %vm845_vm2, %v3029_v39, 0  ;;  %v2292_v0 = vsel %vm654_vm0, %v2290_v45, %v2291_v46 }
  0x61   : > { %2204 = vrot.lane.b32.xlu1 %v2053_v60, %s3564_s5  ;;  %v2059_v60 = vrot.slane %v2057_v43, 1  ;;  %v3914_v43 = vld [vmem:[%s3646_s30 + $0x54] sm:$0xff]   ;;  %2472 = vmatpush.bf16.msra.mxu2 %v3920_v47 }
  0x62   : > { %v2069_v20 = vshll.u32 %v3914_v43, 16 }
  0x63   : > { %604 = vrot.lane.b32.xlu0 %v573_v3, %s3564_s5  ;;  %v1474_v3 = vrot.slane %v3434_v57, 1  ;;  %v3892_v14 = vor.u32 %v2059_v60, %v2055_v13  ;;  %v2997_v57 = vld [vmem:[%s3646_s30 + $0x5c] sm:$0x1]  ;;  %v3437_v13 = vor.u32 %v3436_v29, %v3435_v8  ;;  %v3439_v60 = vld [vmem:[%s3646_s30 + $0x54] sm:$0xe] }
  0x64   : > { %v1979_v6 = vunpack.c.l.b16 %v2997_v57  ;;  %v2911_v8 = vld [vmem:[%s3646_s30 + $0x50] sm:$0x1]  ;;  %v3440_v26 = vor.u32 %v3439_v60, %v3438_v11  ;;  %v2071_v39 = vrot.slane %v2069_v20, 1  ;;  %v2920_v57 = vld [vmem:[%s3646_s30 + $0xbc] sm:$0x1] }
  0x65   : > { %733 = vrot.lane.b32.xlu2 %v702_v31, %s3563_s4  ;;  %v1476_v22 = vsel %vm654_vm0, %v1474_v3, %v1475_v4  ;;  %v2065_v28 = vsel %vm381_vm1, %v3892_v14, %v2064_v36  ;;  %v3903_v31 = vpack.c.b16 %v1147_v18, %v1147_v18  ;;  %v3052_v3 = vld [vmem:[%s4728_s1 + $0x8] sm:$0x30]  ;;  %v1450_v12 = vrot.slane %v3437_v13, 1  ;;  %v227_v20 = vld [vmem:[%s3646_s30 + $0x50] sm:$0x1] }
  0x66   : > { %v3288_v36 = vld [vmem:[%s3646_s30 + $0xa8] sm:$0xf0]  ;;  %v1995_v25 = vpack.c.b16 %v1979_v6, %v1979_v6  ;;  %v2293_v45 = vrot.slane %v3440_v26, 1 }
  0x68   : > { %v2294_v46 = vrot.slane %v1995_v25, 1 }
  0x69   : > { %580 = vrot.lane.b32.xlu1 %v429_v23, %s3564_s5  ;;  %v3246_v23 = vor.u32 %v3245_v9, %v3244_v55  ;;  %v3940_v55 = vld [vmem:[%s3646_s30 + $0x3c] sm:$0xff]  }
  0x6a   : > { %v3943_v9 = vld [vmem:[%s3646_s30 + $0x3c] sm:$0xf0] }
  0x6b   : > { %2332 = vrot.lane.b32.xlu0 %v2289_v30, %s3563_s4  ;;  %v1321_v30 = vsel %vm381_vm1, %v1316_v15, %v1320_v49  ;;  %v667_v24 = vrot.slane %v3246_v23, 1  ;;  %v3289_v15 = vld [vmem:[%s3646_s30 + $0xa8] sm:$0xe]  ;;  %v1220_v49 = vor.u32 %v1219_v42, %v1215_v51  ;;  %v1139_v23 = vunpack.c.l.b16 %v2911_v8 }
  0x6c   : > { %v2295_v42 = vsel %vm654_vm0, %v2293_v45, %v2294_v46 }
  0x6d   : > { %709 = vrot.lane.b32.xlu2 %v666_v62, %s3563_s4  ;;  %v669_v56 = vsel %vm654_vm0, %v667_v24, %v668_v37  ;;  %v441_v62 = vsel %vm381_vm1, %v3790_v63, %v440_v40  ;;  %v2943_v63 = vor.u32 %v3052_v3, %v2942_v2  ;;  %v3963_v24 = vld [vmem:[%s3646_s30 + $0xb4] sm:$0xf0]  ;;  %v2067_v37 = vshrl.u32 %v3914_v43, 16  ;;  %v3297_v2 = vld [vmem:[%s3646_s30 + $0x60] sm:$0xff]  }
  0x6e   : > { %v2074_v40 = vshll.u32 %v1995_v25, 16  ;;  %v3968_v44 = vpack.c.b16 %v1139_v23, %v1139_v23 }
  0x6f   : > { %v1623_v21 = vsel %vm845_vm2, %v2943_v63, 0  ;;  %v2072_v13 = vor.u32 %v2071_v39, %v2067_v37  ;;  %v355_v37 = vunpack.c.l.b16 %v227_v20  ;;  %v4003_v39 = vld [vmem:[%s3646_s30 + $0x54] sm:$0xff]  }
  0x70   : > { %1632 = vmatpush.bf16.msra.mxu1 %v1623_v21  ;;  %3342 = vmatpush.bf16.msrb.mxu3 %v1623_v21  ;;  %v2076_v60 = vrot.slane %v2074_v40, 1  ;;  %v1234_v51 = vshll.u32 %v3968_v44, 16  ;;  %v1337_v21 = vshll.u32 %v3960_v34, 16  ;;  %v4006_v40 = vld [vmem:[%s3646_s30 + $0x54] sm:$0xf0] }
  0x71   : > { %1492 = vrot.lane.b32.xlu1 %v1449_v52, %s3563_s4  ;;  %v1330_v52 = vshll.u32 %v3903_v31, 16 }
  0x72   : > { %v2077_v3 = vsel %vm381_vm1, %v2072_v13, %v2076_v60  ;;  %v1236_v63 = vrot.slane %v1234_v51, 1  ;;  %v4019_v60 = vpack.c.b16 %v355_v37, %v355_v37 }
  0x73   : > { %1364 = vrot.lane.b32.xlu0 %v1213_v54, %s3564_s5  ;;  %v1154_v54 = vpack.c.b16 %v1138_v32, %v1138_v32  ;;  %v1332_v1 = vrot.slane %v1330_v52, 1  ;;  %v354_v52 = vunpack.c.l.b16 %v226_v16  ;;  %v3277_v16 = vld [vmem:[%s3646_s30 + $0x48] sm:$0xe] }
  0x74   : > { %v1237_v26 = vsel %vm381_vm1, %v3892_v14, %v1236_v63 }
  0x75   : > { %1382 = vrot.lane.b32.xlu2 %v1321_v30, %s3564_s5  ;;  %v1222_v61 = vshll.u32 %v1154_v54, 16  ;;  %v1451_v4 = vrot.slane %v1154_v54, 1  ;;  %v1478_v54 = vrot.slane %v3903_v31, 1  ;;  %v1148_v31 = vunpack.c.l.b16 %v2920_v57 }
  0x77   : > { %v1224_v18 = vrot.slane %v1222_v61, 1  ;;  %v1452_v29 = vsel %vm654_vm0, %v1450_v12, %v1451_v4  ;;  %v370_v61 = vpack.c.b16 %v354_v52, %v354_v52  ;;  %v443_v4 = vshrl.u32 %v3940_v55, 16 }
  0x79   : > { %1510 = vrot.lane.b32.xlu1 %v1476_v22, %s3563_s4  ;;  %v1333_v22 = vsel %vm381_vm1, %v3752_v19, %v1332_v1  ;;  %v1225_v32 = vsel %vm381_vm1, %v1220_v49, %v1224_v18  ;;  %v3443_v1 = vor.u32 %v3442_v33, %v3943_v9  ;;  %v450_v8 = vshll.u32 %v370_v61, 16 }
  0x7a   : > { %v671_v49 = vrot.slane %v370_v61, 1  ;;  %v3988_v18 = vpack.c.b16 %v1148_v31, %v1148_v31 }
  0x7b   : > { %2206 = vrot.lane.b32.xlu0 %v2065_v28, %s3564_s5  ;;  %v3290_v28 = vor.u32 %v3289_v15, %v3288_v36  ;;  %v2081_v36 = vshll.u32 %v3297_v2, 16  ;;  %v670_v9 = vrot.slane %v3443_v1, 1  ;;  %v452_v23 = vrot.slane %v450_v8, 1 }
  0x7c   : > { %v1342_v46 = vshll.u32 %v3988_v18, 16  ;;  %v1454_v1 = vrot.slane %v3968_v44, 1  ;;  %v4043_v44 = vld [vmem:[%s3646_s30 + $0x6c] sm:$0xf0]  ;;  %v1481_v37 = vrot.slane %v3988_v18, 1 }
  0x7d   : > { %2334 = vrot.lane.b32.xlu2 %v2292_v0, %s3563_s4  ;;  %v672_v45 = vsel %vm654_vm0, %v670_v9, %v671_v49  ;;  %v4040_v49 = vld [vmem:[%s3646_s30 + $0x6c] sm:$0xff]  }
  0x7f   : > { %v704_v41 = vpop.permute.xlu2 %703 }
  0x81   : > { %711 = vrot.lane.b32.xlu1 %v669_v56, %s3563_s4  ;;  %v2998_v56 = vld [vmem:[%s3646_s30 + $0x68] sm:$0x1] }
  0x83   : > { %582 = vrot.lane.b32.xlu0 %v441_v62, %s3564_s5  ;;  %v1980_v62 = vunpack.c.l.b16 %v2998_v56  ;;  %v3445_v56 = vld [vmem:[%s3646_s30 + $0xb4] sm:$0xe] }
  0x85   : > { %1366 = vrot.lane.b32.xlu2 %v1225_v32, %s3564_s5  ;;  %v3985_v12 = vpack.c.b16 %v1980_v62, %v1980_v62  ;;  %v3311_v62 = vld [vmem:[%s3646_s30 + $0x60] sm:$0xf0] }
  0x87   : > { %v575_v30 = vpop.permute.xlu2 %574  ;;  %v2086_v33 = vshll.u32 %v3985_v12, 16 }
  0x88   : > { %v737_v19 = vsel %vm735_vm3, %v3671_v38, %v575_v30  ;;  %v1477_v38 = vrot.slane %v3290_v28, 1  ;;  %v2079_v28 = vshrl.u32 %v3297_v2, 16  ;;  %v3276_v30 = vld [vmem:[%s3646_s30 + $0x48] sm:$0xf0] }
  0x89   : > { %1384 = vrot.lane.b32.xlu1 %v1333_v22, %s3564_s5  ;;  %v770_v11 = vsel %vm768_vm4, %v737_v19, %v704_v41  ;;  %v445_v41 = vshll.u32 %v3940_v55, 16  ;;  %v2083_v19 = vrot.slane %v2081_v36, 1  ;;  %v2088_v13 = vrot.slane %v2086_v33, 1 }
  0x8a   : > { %2858 = vmatmul.msk.bf16.vlgmr.msra.gmra.mxu0 %vm812_vm5, %v770_v11  ;;  %v1479_v0 = vsel %vm654_vm0, %v1477_v38, %v1478_v54  ;;  %v1335_v38 = vshrl.u32 %v3960_v34, 16  ;;  %v3278_v54 = vor.u32 %v3277_v16, %v3276_v30  ;;  %v462_v36 = vshll.u32 %v4019_v60, 16 }
  0x8b   : > { %1494 = vrot.lane.b32.xlu0 %v1452_v29, %s3563_s4  ;;  %v447_v6 = vrot.slane %v445_v41, 1  ;;  %v4017_v57 = vor.u32 %v2083_v19, %v2079_v28  ;;  %v2912_v41 = vld [vmem:[%s3646_s30 + $0x5c] sm:$0x1]  ;;  %v2297_v16 = vrot.slane %v3985_v12, 1  ;;  %v2999_v19 = vld [vmem:[%s3646_s30 + $0x74] sm:$0x1] }
  0x8c   : > { %v1981_v18 = vunpack.c.l.b16 %v2999_v19  ;;  %v3451_v19 = vld [vmem:[%s3646_s30 + $0x54] sm:$0xe] }
  0x8d   : > { %2208 = vrot.lane.b32.xlu2 %v2077_v3, %s3564_s5  ;;  %v448_v22 = vor.u32 %v447_v6, %v443_v4  ;;  %v3448_v3 = vld [vmem:[%s3646_s30 + $0x54] sm:$0xe]  ;;  %v1140_v4 = vunpack.c.l.b16 %v2912_v41  ;;  %v4031_v6 = vld [vmem:[%s3646_s30 + $0x18] sm:$0xff]   ;;  %v2089_v63 = vsel %vm381_vm1, %v4017_v57, %v2088_v13 }
  0x8f   : > { %v3995_v29 = vpop.permute.xlu2 %600  ;;  %v453_v52 = vsel %vm381_vm1, %v448_v22, %v452_v23  ;;  %v3446_v22 = vor.u32 %v3445_v56, %v3963_v24  ;;  %v1156_v23 = vpack.c.b16 %v1140_v4, %v1140_v4  ;;  %v1239_v24 = vshrl.u32 %v4003_v39, 16 }
  0x91   : > { %2336 = vrot.lane.b32.xlu1 %v2295_v42, %s3563_s4  ;;  %v1344_v42 = vrot.slane %v1342_v46, 1  ;;  %v1480_v33 = vrot.slane %v3446_v22, 1  ;;  %v1246_v46 = vshll.u32 %v1156_v23, 16 }
  0x93   : > { %v728_v15 = vpop.permute.xlu1 %727  ;;  %1512 = vrot.lane.b32.xlu0 %v1479_v0, %s3563_s4  ;;  %v3312_v0 = vld [vmem:[%s3646_s30 + $0x60] sm:$0xe] }
  0x94   : > { %v3313_v9 = vor.u32 %v3312_v0, %v3311_v62  ;;  %v1248_v0 = vrot.slane %v1246_v46, 1  ;;  %v3454_v46 = vld [vmem:[%s3646_s30 + $0x6c] sm:$0xe] }
  0x95   : > { %v599_v25 = vpop.permute.xlu0 %598  ;;  %584 = vrot.lane.b32.xlu2 %v453_v52, %s3564_s5  ;;  %v3248_v52 = vld [vmem:[%s3646_s30 + $0x48] sm:$0xe] }
  0x96   : > { %v761_v32 = vsel %vm735_vm3, %v3652_v5, %v599_v25  ;;  %v1339_v5 = vrot.slane %v1337_v21, 1  ;;  %v1241_v25 = vshll.u32 %v4003_v39, 16  ;;  %v2296_v30 = vrot.slane %v3313_v9, 1  ;;  %v228_v9 = vld [vmem:[%s3646_s30 + $0x5c] sm:$0x1] }
  0x97   : > { %v794_v11 = vsel %vm768_vm4, %v761_v32, %v728_v15  ;;  %v4027_v31 = vpop.permute.xlu2 %2328  ;;  %v3449_v32 = vor.u32 %v3448_v3, %v4006_v40  ;;  %v763_v3 = vsel %vm735_vm3, %v3683_v53, %v3995_v29 }
  0x98   : > { %2870 = vmatmul.msk.bf16.vlgmr.msra.gmra.mxu3 %vm812_vm5, %v794_v11  ;;  %v1340_v61 = vor.u32 %v1339_v5, %v1335_v38  ;;  %v3247_v5 = vld [vmem:[%s3646_s30 + $0x48] sm:$0xf0]  ;;  %v2298_v13 = vsel %vm654_vm0, %v2296_v30, %v2297_v16 }
  0x99   : > { %1368 = vrot.lane.b32.xlu1 %v1237_v26, %s3564_s5  ;;  %3343 = vmatpush.bf16.msra.mxu3 %v3920_v47  ;;  %v1453_v47 = vrot.slane %v3278_v54, 1  ;;  %v464_v26 = vrot.slane %v462_v36, 1  ;;  %v2921_v54 = vld [vmem:[%s3646_s30 + $0xc8] sm:$0x1]  ;;  %v1456_v41 = vrot.slane %v3449_v32, 1  ;;  %v4088_v36 = vpack.c.b16 %v1981_v18, %v1981_v18 }
  0x9a   : > { %v1345_v20 = vsel %vm381_vm1, %v1340_v61, %v1344_v42  ;;  %v4072_v42 = vld [vmem:[%s3646_s30 + $0x54] sm:$0xff]   ;;  %v3249_v61 = vor.u32 %v3248_v52, %v3247_v5 }
  0x9b   : > { %v2327_v51 = vpop.permute.xlu1 %2326  ;;  %713 = vrot.lane.b32.xlu0 %v672_v45, %s3563_s4  ;;  %v1455_v21 = vsel %vm654_vm0, %v1453_v47, %v1454_v1  ;;  %v1243_v45 = vrot.slane %v1241_v25, 1  ;;  %v465_v40 = vsel %vm381_vm1, %v3892_v14, %v464_v26  ;;  %v1457_v14 = vrot.slane %v1156_v23, 1  ;;  %v4079_v1 = vld [vmem:[%s3646_s30 + $0xc0] sm:$0xff]  }
  0x9c   : > { %v1149_v47 = vunpack.c.l.b16 %v2921_v54  ;;  %v1349_v22 = vshll.u32 %v4079_v1, 16  ;;  %v469_v18 = vshll.u32 %v4072_v42, 16 }
  0x9d   : > { %v2199_v2 = vpop.permute.xlu0 %2198  ;;  %1496 = vrot.lane.b32.xlu2 %v1455_v21, %s3563_s4  ;;  %v1244_v62 = vor.u32 %v1243_v45, %v1239_v24  ;;  %v674_v21 = vrot.slane %v4019_v60, 1  ;;  %v1458_v53 = vsel %vm654_vm0, %v1456_v41, %v1457_v14  ;;  %v2091_v60 = vshrl.u32 %v4040_v49, 16 }
  0x9e   : > { %v2359_v8 = vsel %vm735_vm3, %v4031_v6, %v2199_v2  ;;  %v2093_v2 = vshll.u32 %v4040_v49, 16  ;;  %v1165_v25 = vpack.c.b16 %v1149_v47, %v1149_v47  ;;  %v2098_v24 = vshll.u32 %v4088_v36, 16 }
  0x9f   : > { %v2391_v15 = vsel %vm768_vm4, %v2359_v8, %v2327_v51  ;;  %v4058_v38 = vpop.permute.xlu2 %1360  ;;  %v1482_v51 = vsel %vm654_vm0, %v1480_v33, %v1481_v37  ;;  %v3291_v8 = vld [vmem:[%s3646_s30 + $0xc0] sm:$0xf0]  ;;  %v1249_v29 = vsel %vm381_vm1, %v1244_v62, %v1248_v0  ;;  %v356_v33 = vunpack.c.l.b16 %v228_v9 }
  0xa0   : > { %3030 = vmatmul.msk.bf16.vlgmr.msra.gmra.mxu2 %vm812_vm5, %v2391_v15  ;;  %v2095_v16 = vrot.slane %v2093_v2, 1  ;;  %v1351_v45 = vrot.slane %v1349_v22, 1  ;;  %v1484_v52 = vrot.slane %v1165_v25, 1  ;;  %v2100_v54 = vrot.slane %v2098_v24, 1  ;;  %v4125_v2 = vld [vmem:[%s3646_s30 + $0x78] sm:$0xff]  }
  0xa1   : > { %2210 = vrot.lane.b32.xlu1 %v2089_v63, %s3564_s5  ;;  %v3292_v63 = vld [vmem:[%s3646_s30 + $0xc0] sm:$0xe]  ;;  %v471_v9 = vrot.slane %v469_v18, 1  ;;  %v1521_v24 = vsel %vm735_vm3, %v4031_v6, %v4058_v38 }
  0xa2   : > { %v3293_v30 = vor.u32 %v3292_v63, %v3291_v8  ;;  %v2913_v63 = vld [vmem:[%s3646_s30 + $0x68] sm:$0x1] }
  0xa3   : > { %v1487_v28 = vpop.permute.xlu1 %1486  ;;  %1386 = vrot.lane.b32.xlu0 %v1345_v20, %s3564_s5  ;;  %v673_v20 = vrot.slane %v3249_v61, 1 }
  0xa4   : > { %v1483_v5 = vrot.slane %v3293_v30, 1 }
  0xa5   : > { %v1359_v11 = vpop.permute.xlu0 %1358  ;;  %1514 = vrot.lane.b32.xlu2 %v1482_v51, %s3563_s4  ;;  %v675_v37 = vsel %vm654_vm0, %v673_v20, %v674_v21  ;;  %v2105_v21 = vshll.u32 %v4125_v2, 16 }
  0xa6   : > { %v1519_v12 = vsel %vm735_vm3, %v3664_v27, %v1359_v11  ;;  %v4075_v27 = vld [vmem:[%s3646_s30 + $0x54] sm:$0xf0]  ;;  %v1347_v11 = vshrl.u32 %v4079_v1, 16  ;;  %v1485_v0 = vsel %vm654_vm0, %v1483_v5, %v1484_v52  ;;  %v3321_v52 = vld [vmem:[%s3646_s30 + $0xa8] sm:$0xe] }
  0xa7   : > { %v1551_v56 = vsel %vm768_vm4, %v1519_v12, %v1487_v28  ;;  %v4098_v26 = vpop.permute.xlu2 %2202  ;;  %v3000_v12 = vld [vmem:[%s3646_s30 + $0x80] sm:$0x1]  ;;  %v3452_v47 = vor.u32 %v3451_v19, %v4075_v27  ;;  %v3455_v27 = vor.u32 %v3454_v46, %v4043_v44  ;;  %v3279_v44 = vld [vmem:[%s3646_s30 + $0x60] sm:$0xf0] }
  0xa8   : > { %2944 = vmatmul.msk.bf16.vlgmr.msra.gmra.mxu1 %vm812_vm5, %v1551_v56  ;;  %v372_v56 = vpack.c.b16 %v356_v33, %v356_v33  ;;  %v1982_v14 = vunpack.c.l.b16 %v3000_v12  ;;  %v2103_v33 = vshrl.u32 %v4125_v2, 16 }
  0xa9   : > { %586 = vrot.lane.b32.xlu1 %v465_v40, %s3564_s5  ;;  %v2096_v40 = vor.u32 %v2095_v16, %v2091_v60  ;;  %v676_v22 = vrot.slane %v3452_v47, 1  ;;  %v3280_v60 = vld [vmem:[%s3646_s30 + $0x60] sm:$0xe]  ;;  %v2299_v16 = vrot.slane %v3455_v27, 1  ;;  %v4172_v47 = vld [vmem:[%s3646_s30 + $0x30] sm:$0xff]  }
  0xaa   : > { %v474_v8 = vshll.u32 %v372_v56, 16  ;;  %v4136_v20 = vpack.c.b16 %v1982_v14, %v1982_v14  ;;  %v3281_v38 = vor.u32 %v3280_v60, %v3279_v44  ;;  %v3315_v27 = vld [vmem:[%s3646_s30 + $0x78] sm:$0xe] }
  0xab   : > { %v730_v4 = vpop.permute.xlu1 %729  ;;  %2338 = vrot.lane.b32.xlu0 %v2298_v13, %s3563_s4  ;;  %v4116_v13 = vor.u32 %v1351_v45, %v1347_v11 }
  0xac   : > { %v796_v15 = vsel %vm768_vm4, %v763_v3, %v730_v4  ;;  %v2101_v4 = vsel %vm381_vm1, %v2096_v40, %v2100_v54  ;;  %v2110_v11 = vshll.u32 %v4136_v20, 16  ;;  %v4161_v40 = vld [vmem:[%s3646_s30 + $0x6c] sm:$0xf0] }
  0xad   : > { %v2201_v23 = vpop.permute.xlu0 %2200  ;;  %2871 = vmatmul.msk.bf16.gmra.mxu3 %vm812_vm5, %v796_v15  ;;  %715 = vrot.lane.b32.xlu2 %v675_v37, %s3563_s4  ;;  %v467_v15 = vshrl.u32 %v4072_v42, 16  ;;  %v2107_v37 = vrot.slane %v2105_v21, 1 }
  0xae   : > { %v2361_v28 = vsel %vm735_vm3, %v3690_v58, %v2201_v23  ;;  %v1354_v58 = vshll.u32 %v1165_v25, 16  ;;  %v677_v23 = vrot.slane %v372_v56, 1  ;;  %v476_v25 = vrot.slane %v474_v8, 1 }
  0xaf   : > { %v2393_v32 = vsel %vm768_vm4, %v2361_v28, %v4027_v31  ;;  %v4118_v61 = vpop.permute.xlu2 %578  ;;  %v3004_v28 = vld [vmem:[%s3646_s30 + $0xb0] sm:$0x1]  ;;  %v472_v30 = vor.u32 %v471_v9, %v467_v15  ;;  %v1459_v8 = vrot.slane %v3281_v38, 1  ;;  %v2914_v15 = vld [vmem:[%s3646_s30 + $0x74] sm:$0x1] }
  0xb0   : > { %3031 = vmatmul.msk.bf16.gmra.mxu2 %vm812_vm5, %v2393_v32  ;;  %v1356_v41 = vrot.slane %v1354_v58, 1  ;;  %v2300_v32 = vrot.slane %v4088_v36, 1  ;;  %v678_v46 = vsel %vm654_vm0, %v676_v22, %v677_v23  ;;  %v3320_v36 = vld [vmem:[%s3646_s30 + $0xa8] sm:$0xf0]  ;;  %v1986_v12 = vunpack.c.l.b16 %v3004_v28 }
  0xb1   : > { %1498 = vrot.lane.b32.xlu1 %v1458_v53, %s3563_s4  ;;  %v1141_v53 = vunpack.c.l.b16 %v2913_v63  ;;  %v477_v54 = vsel %vm381_vm1, %v472_v30, %v476_v25  ;;  %v3322_v14 = vor.u32 %v3321_v52, %v3320_v36  ;;  %v4185_v23 = vld [vmem:[%s3646_s30 + $0xa8] sm:$0xff]  }
  0xb2   : > { %v2301_v56 = vsel %vm654_vm0, %v2299_v16, %v2300_v32  ;;  %v1142_v16 = vunpack.c.l.b16 %v2914_v15  ;;  %v4196_v32 = vld [vmem:[%s3646_s30 + $0xb4] sm:$0xff]   ;;  %v741_v15 = vsel %vm735_vm3, %v4031_v6, %v4118_v61  ;;  %v4240_v61 = vld [vmem:[%s3646_s30 + $0x6c] sm:$0xff]  }
  0xb3   : > { %v706_v31 = vpop.permute.xlu1 %705  ;;  %1370 = vrot.lane.b32.xlu0 %v1249_v29, %s3564_s5  ;;  %v1157_v5 = vpack.c.b16 %v1141_v53, %v1141_v53  ;;  %v2314_v28 = vrot.slane %v3322_v14, 1  ;;  %v2303_v14 = vrot.slane %v4136_v20, 1 }
  0xb5   : > { %v577_v51 = vpop.permute.xlu0 %576  ;;  %v1258_v18 = vshll.u32 %v1157_v5, 16  ;;  %v1460_v63 = vrot.slane %v1157_v5, 1 }
  0xb6   : > { %v739_v62 = vsel %vm735_vm3, %v3702_v7, %v577_v51  ;;  %v1357_v7 = vsel %vm381_vm1, %v4116_v13, %v1356_v41  ;;  %v4166_v41 = vor.u32 %v2107_v37, %v2103_v33  ;;  %v2112_v51 = vrot.slane %v2110_v11, 1  ;;  %v229_v33 = vld [vmem:[%s3646_s30 + $0x68] sm:$0x1] }
  0xb7   : > { %v772_v3 = vsel %vm768_vm4, %v739_v62, %v706_v31  ;;  %1388 = vrot.lane.b32.xlu2 %v1357_v7, %s3564_s5  ;;  %v4150_v45 = vpop.permute.xlu2 %1490  ;;  %v4158_v31 = vld [vmem:[%s3646_s30 + $0x6c] sm:$0xff]   ;;  %v3314_v7 = vld [vmem:[%s3646_s30 + $0x78] sm:$0xf0]  ;;  %v1260_v21 = vrot.slane %v1258_v18, 1  ;;  %v4207_v11 = vld [vmem:[%s3646_s30 + $0x84] sm:$0xff]  }
  0xb8   : > { %2859 = vmatmul.msk.bf16.gmra.mxu0 %vm812_vm5, %v772_v3  ;;  %v4169_v62 = vld [vmem:[%s3646_s30 + $0xa8] sm:$0xff]   ;;  %v2363_v3 = vsel %vm735_vm3, %v4172_v47, %v4098_v26  ;;  %v2113_v25 = vsel %vm381_vm1, %v4166_v41, %v2112_v51  ;;  %v1265_v38 = vshll.u32 %v4158_v31, 16 }
  0xb9   : > { %1516 = vrot.lane.b32.xlu1 %v1485_v0, %s3563_s4  ;;  %v2002_v0 = vpack.c.b16 %v1986_v12, %v1986_v12  ;;  %v2153_v22 = vshll.u32 %v4169_v62, 16  ;;  %v1261_v37 = vsel %vm381_vm1, %v4017_v57, %v1260_v21  ;;  %v4215_v12 = vpack.c.b16 %v1142_v16, %v1142_v16 }
  0xbb   : > { %v603_v29 = vpop.permute.xlu1 %602  ;;  %2212 = vrot.lane.b32.xlu0 %v2101_v4, %s3564_s5  ;;  %v2315_v60 = vrot.slane %v2002_v0, 1  ;;  %v2155_v5 = vrot.slane %v2153_v22, 1  ;;  %v2158_v36 = vshll.u32 %v2002_v0, 16 }
  0xbc   : > { %v765_v26 = vsel %vm735_vm3, %v4185_v23, %v603_v29  ;;  %v1461_v29 = vsel %vm654_vm0, %v1459_v8, %v1460_v63 }
  0xbd   : > { %v1489_v19 = vpop.permute.xlu0 %1488  ;;  %v2316_v52 = vsel %vm654_vm0, %v2314_v28, %v2315_v60  ;;  %v2160_v63 = vrot.slane %v2158_v36, 1 }
  0xbe   : > { %v1553_v58 = vsel %vm768_vm4, %v1521_v24, %v1489_v19  ;;  %v4199_v24 = vld [vmem:[%s3646_s30 + $0xb4] sm:$0xf0]  ;;  %v3316_v19 = vor.u32 %v3315_v27, %v3314_v7  ;;  %v3250_v7 = vld [vmem:[%s3646_s30 + $0x60] sm:$0xf0]  ;;  %v3251_v27 = vld [vmem:[%s3646_s30 + $0x60] sm:$0xe] }
  0xbf   : > { %2945 = vmatmul.msk.bf16.gmra.mxu1 %vm812_vm5, %v1553_v58  ;;  %2340 = vrot.lane.b32.xlu2 %v2301_v56, %s3563_s4  ;;  %v4192_v30 = vpop.permute.xlu2 %733  ;;  %v4210_v58 = vld [vmem:[%s3646_s30 + $0x84] sm:$0xf0]  ;;  %v3005_v56 = vld [vmem:[%s3646_s30 + $0xbc] sm:$0x1] }
  0xc0   : > { %v2302_v51 = vrot.slane %v3316_v19, 1  ;;  %v2165_v19 = vshll.u32 %v4196_v32, 16 }
  0xc1   : > { %717 = vrot.lane.b32.xlu1 %v678_v46, %s3563_s4  ;;  %v2151_v46 = vshrl.u32 %v4169_v62, 16 }
  0xc2   : > { %v2304_v28 = vsel %vm654_vm0, %v2302_v51, %v2303_v14  ;;  %v2163_v14 = vshrl.u32 %v4196_v32, 16 }
  0xc3   : > { %v2331_v4 = vpop.permute.xlu1 %2330  ;;  %588 = vrot.lane.b32.xlu0 %v477_v54, %s3564_s5  ;;  %v357_v54 = vunpack.c.l.b16 %v229_v33  ;;  %v2156_v8 = vor.u32 %v2155_v5, %v2151_v46  ;;  %v3457_v33 = vld [vmem:[%s3646_s30 + $0x6c] sm:$0xe] }
  0xc4   : > { %v2395_v9 = vsel %vm768_vm4, %v2363_v3, %v2331_v4  ;;  %v1263_v3 = vshrl.u32 %v4158_v31, 16  ;;  %v3001_v4 = vld [vmem:[%s3646_s30 + $0x8c] sm:$0x1] }
  0xc5   : > { %v732_v53 = vpop.permute.xlu0 %731  ;;  %3032 = vmatmul.msk.bf16.gmra.mxu2 %vm812_vm5, %v2395_v9  ;;  %v1983_v6 = vunpack.c.l.b16 %v3001_v4  ;;  %v2161_v60 = vsel %vm381_vm1, %v2156_v8, %v2160_v63 }
  0xc6   : > { %v798_v44 = vsel %vm768_vm4, %v765_v26, %v732_v53  ;;  %v1267_v26 = vrot.slane %v1265_v38, 1  ;;  %v1270_v53 = vshll.u32 %v4215_v12, 16  ;;  %v2117_v38 = vshll.u32 %v4207_v11, 16 }
  0xc7   : > { %2872 = vmatmul.msk.bf16.gmra.mxu3 %vm812_vm5, %v798_v44  ;;  %1372 = vrot.lane.b32.xlu2 %v1261_v37, %s3564_s5  ;;  %v4233_v21 = vpop.permute.xlu2 %709  ;;  %v3252_v44 = vor.u32 %v3251_v27, %v3250_v7  ;;  %v4253_v36 = vpack.c.b16 %v1983_v6, %v1983_v6 }
  0xc8   : > { %v1268_v37 = vor.u32 %v1267_v26, %v1263_v3  ;;  %v1272_v46 = vrot.slane %v1270_v53, 1  ;;  %v2119_v7 = vrot.slane %v2117_v38, 1  ;;  %v3458_v26 = vor.u32 %v3457_v33, %v4161_v40  ;;  %v2915_v40 = vld [vmem:[%s3646_s30 + $0x80] sm:$0x1] }
  0xc9   : > { %2214 = vrot.lane.b32.xlu1 %v2113_v25, %s3564_s5  ;;  %v373_v25 = vpack.c.b16 %v357_v54, %v357_v54  ;;  %v230_v54 = vld [vmem:[%s3646_s30 + $0x74] sm:$0x1]  ;;  %v2122_v27 = vshll.u32 %v4253_v36, 16  ;;  %v1463_v33 = vrot.slane %v4215_v12, 1 }
  0xca   : > { %v1273_v63 = vsel %vm381_vm1, %v1268_v37, %v1272_v46 }
  0xcb   : > { %v1363_v18 = vpop.permute.xlu1 %1362  ;;  %1500 = vrot.lane.b32.xlu0 %v1461_v29, %s3563_s4  ;;  %v486_v16 = vshll.u32 %v373_v25, 16 }
  0xcc   : > { %v1523_v0 = vsel %vm735_vm3, %v3743_v59, %v1363_v18  ;;  %v1987_v59 = vunpack.c.l.b16 %v3005_v56  ;;  %v679_v56 = vrot.slane %v3252_v44, 1  ;;  %v680_v18 = vrot.slane %v373_v25, 1  ;;  %v3463_v25 = vld [vmem:[%s3646_s30 + $0x84] sm:$0xe] }
  0xcd   : > { %v708_v9 = vpop.permute.xlu0 %707  ;;  %v1555_v20 = vsel %vm768_vm4, %v1523_v0, %v4150_v45  ;;  %v4243_v45 = vld [vmem:[%s3646_s30 + $0x6c] sm:$0xf0]  ;;  %v2167_v0 = vrot.slane %v2165_v19, 1  ;;  %v1462_v19 = vrot.slane %v3458_v26, 1 }
  0xce   : > { %v774_v22 = vsel %vm768_vm4, %v741_v15, %v708_v9  ;;  %v4248_v29 = vpack.c.b16 %v1987_v59, %v1987_v59  ;;  %v358_v15 = vunpack.c.l.b16 %v230_v54  ;;  %v681_v59 = vsel %vm654_vm0, %v679_v56, %v680_v18 }
  0xcf   : > { %2860 = vmatmul.msk.bf16.gmra.mxu0 %vm812_vm5, %v774_v22  ;;  %2946 = vmatmul.msk.bf16.gmra.mxu1 %vm812_vm5, %v1555_v20  ;;  %v4260_v4 = vpop.permute.xlu2 %1382  ;;  %v2115_v20 = vshrl.u32 %v4207_v11, 16  ;;  %v3460_v22 = vld [vmem:[%s3646_s30 + $0xb4] sm:$0xe]  ;;  %v2168_v53 = vor.u32 %v2167_v0, %v2163_v14  ;;  %v3464_v14 = vor.u32 %v3463_v25, %v4210_v58  ;;  %v3466_v0 = vld [vmem:[%s3646_s30 + $0x6c] sm:$0xe]  ;;  %v2306_v58 = vrot.slane %v4253_v36, 1 }
  0xd0   : > { %2222 = vrot.lane.b32.xlu2 %v2161_v60, %s3564_s5  ;;  %v2170_v3 = vshll.u32 %v4248_v29, 16  ;;  %v4277_v6 = vpack.c.b16 %v358_v15, %v358_v15 }
  0xd1   : > { %2350 = vrot.lane.b32.xlu1 %v2316_v52, %s3563_s4  ;;  %v488_v52 = vrot.slane %v486_v16, 1  ;;  %v2120_v60 = vor.u32 %v2119_v7, %v2115_v20  ;;  %v2124_v16 = vrot.slane %v2122_v27, 1  ;;  %v2318_v7 = vrot.slane %v4248_v29, 1  ;;  %v3006_v27 = vld [vmem:[%s3646_s30 + $0xc8] sm:$0x1] }
  0xd2   : > { %v498_v12 = vshll.u32 %v4277_v6, 16  ;;  %v1988_v29 = vunpack.c.l.b16 %v3006_v27 }
  0xd3   : > { %v2205_v5 = vpop.permute.xlu1 %2204  ;;  %2342 = vrot.lane.b32.xlu0 %v2304_v28, %s3563_s4  ;;  %v493_v28 = vshll.u32 %v4240_v61, 16 }
  0xd4   : > { %v2365_v37 = vsel %vm735_vm3, %v3764_v35, %v2205_v5  ;;  %v3461_v35 = vor.u32 %v3460_v22, %v4199_v24  ;;  %v2125_v5 = vsel %vm381_vm1, %v2120_v60, %v2124_v16  ;;  %v3283_v24 = vld [vmem:[%s3646_s30 + $0x78] sm:$0xe]  ;;  %v3467_v16 = vor.u32 %v3466_v0, %v4243_v45 }
  0xd5   : > { %v605_v51 = vpop.permute.xlu0 %604  ;;  %v4332_v45 = vpack.c.b16 %v1988_v29, %v1988_v29 }
  0xd6   : > { %v767_v8 = vsel %vm735_vm3, %v3775_v48, %v605_v51  ;;  %v489_v48 = vsel %vm381_vm1, %v4017_v57, %v488_v52  ;;  %v495_v52 = vrot.slane %v493_v28, 1  ;;  %v1464_v51 = vsel %vm654_vm0, %v1462_v19, %v1463_v33 }
  0xd7   : > { %v800_v9 = vsel %vm768_vm4, %v767_v8, %v4192_v30  ;;  %v2172_v30 = vrot.slane %v2170_v3, 1  ;;  %v4291_v56 = vpop.permute.xlu2 %2334  ;;  %v500_v8 = vrot.slane %v498_v12, 1  ;;  %v2317_v15 = vrot.slane %v3461_v35, 1 }
  0xd8   : > { %2873 = vmatmul.msk.bf16.gmra.mxu3 %vm812_vm5, %v800_v9  ;;  %590 = vrot.lane.b32.xlu2 %v489_v48, %s3564_s5  ;;  %v3282_v9 = vld [vmem:[%s3646_s30 + $0x78] sm:$0xf0]  ;;  %v682_v12 = vrot.slane %v3467_v16, 1  ;;  %v683_v35 = vrot.slane %v4277_v6, 1  ;;  %v4352_v6 = vld [vmem:[%s3646_s30 + $0x9c] sm:$0xf0] }
  0xd9   : > { %1374 = vrot.lane.b32.xlu1 %v1273_v63, %s3564_s5  ;;  %v2173_v54 = vsel %vm381_vm1, %v2168_v53, %v2172_v30  ;;  %v3284_v30 = vor.u32 %v3283_v24, %v3282_v9  ;;  %v2319_v36 = vsel %vm654_vm0, %v2317_v15, %v2318_v7  ;;  %v2182_v9 = vshll.u32 %v4332_v45, 16 }
  0xdb   : > { %v581_v44 = vpop.permute.xlu1 %580  ;;  %719 = vrot.lane.b32.xlu0 %v681_v59, %s3563_s4  ;;  %v2305_v59 = vrot.slane %v3464_v14, 1  ;;  %v2184_v29 = vrot.slane %v2182_v9, 1  ;;  %v3471_v9 = vld [vmem:[%s3646_s30 + $0xcc] sm:$0xf0] }
  0xdc   : > { %v743_v57 = vsel %vm735_vm3, %v3796_v10, %v581_v44  ;;  %v491_v10 = vshrl.u32 %v4240_v61, 16  ;;  %v3002_v44 = vld [vmem:[%s3646_s30 + $0x98] sm:$0x1] }
  0xdd   : > { %v2333_v46 = vpop.permute.xlu0 %2332  ;;  %v776_v38 = vsel %vm768_vm4, %v743_v57, %v4233_v21  ;;  %v1143_v21 = vunpack.c.l.b16 %v2915_v40  ;;  %v2307_v60 = vsel %vm654_vm0, %v2305_v59, %v2306_v58  ;;  %v4324_v57 = vld [vmem:[%s3646_s30 + $0x90] sm:$0xff]   ;;  %v1465_v40 = vrot.slane %v3284_v30, 1 }
  0xde   : > { %v2397_v18 = vsel %vm768_vm4, %v2365_v37, %v2333_v46  ;;  %v496_v3 = vor.u32 %v495_v52, %v491_v10  ;;  %v1984_v33 = vunpack.c.l.b16 %v3002_v44  ;;  %v1543_v37 = vsel %vm735_vm3, %v3849_v17, %v4260_v4  ;;  %v231_v52 = vld [vmem:[%s3646_s30 + $0x80] sm:$0x1] }
  0xdf   : > { %2861 = vmatmul.msk.bf16.gmra.mxu0 %vm812_vm5, %v776_v38  ;;  %3033 = vmatmul.msk.bf16.gmra.mxu2 %vm812_vm5, %v2397_v18  ;;  %v1159_v20 = vpack.c.b16 %v1143_v21, %v1143_v21  ;;  %v4311_v48 = vpop.permute.xlu2 %1366  ;;  %v3318_v18 = vld [vmem:[%s3646_s30 + $0x90] sm:$0xe]  ;;  %v2129_v17 = vshll.u32 %v4324_v57, 16  ;;  %v359_v24 = vunpack.c.l.b16 %v231_v52  ;;  %v2127_v7 = vshrl.u32 %v4324_v57, 16 }
  0xe0   : > { %1502 = vrot.lane.b32.xlu2 %v1464_v51, %s3563_s4  ;;  %v501_v53 = vsel %vm381_vm1, %v496_v3, %v500_v8  ;;  %v2000_v0 = vpack.c.b16 %v1984_v33, %v1984_v33  ;;  %v4349_v8 = vld [vmem:[%s3646_s30 + $0x9c] sm:$0xff]   ;;  %v3323_v33 = vld [vmem:[%s3646_s30 + $0xc0] sm:$0xf0] }
  0xe1   : > { %2224 = vrot.lane.b32.xlu1 %v2173_v54, %s3564_s5  ;;  %v1282_v28 = vshll.u32 %v1159_v20, 16  ;;  %v1466_v19 = vrot.slane %v1159_v20, 1  ;;  %v3317_v54 = vld [vmem:[%s3646_s30 + $0x90] sm:$0xf0]  ;;  %v684_v20 = vsel %vm654_vm0, %v682_v12, %v683_v35  ;;  %v2131_v27 = vrot.slane %v2129_v17, 1 }
  0xe2   : > { %v3319_v3 = vor.u32 %v3318_v18, %v3317_v54  ;;  %v2134_v59 = vshll.u32 %v2000_v0, 16  ;;  %v375_v44 = vpack.c.b16 %v359_v24, %v359_v24  ;;  %v2916_v18 = vld [vmem:[%s3646_s30 + $0x8c] sm:$0x1]  ;;  %v3469_v12 = vld [vmem:[%s3646_s30 + $0x84] sm:$0xe]  ;;  %v2185_v35 = vsel %vm381_vm1, %v4116_v13, %v2184_v29 }
  0xe3   : > { %v1493_v63 = vpop.permute.xlu1 %1492  ;;  %2216 = vrot.lane.b32.xlu0 %v2125_v5, %s3564_s5  ;;  %v1284_v38 = vrot.slane %v1282_v28, 1  ;;  %v4343_v5 = vld [vmem:[%s3646_s30 + $0x48] sm:$0xff]   ;;  %v1467_v14 = vsel %vm654_vm0, %v1465_v40, %v1466_v19  ;;  %v3254_v28 = vld [vmem:[%s3646_s30 + $0x78] sm:$0xe] }
  0xe4   : > { %v2308_v58 = vrot.slane %v3319_v3, 1  ;;  %v510_v52 = vshll.u32 %v375_v44, 16  ;;  %v686_v3 = vrot.slane %v375_v44, 1  ;;  %v4398_v13 = vld [vmem:[%s3646_s30 + $0xcc] sm:$0xff]  }
  0xe5   : > { %v1365_v22 = vpop.permute.xlu0 %1364  ;;  %v1285_v15 = vsel %vm381_vm1, %v4166_v41, %v1284_v38 }
  0xe6   : > { %v1525_v26 = vsel %vm735_vm3, %v4172_v47, %v1365_v22  ;;  %v3003_v22 = vld [vmem:[%s3646_s30 + $0xa4] sm:$0x1] }
  0xe7   : > { %v1557_v25 = vsel %vm768_vm4, %v1525_v26, %v1493_v63  ;;  %v4340_v21 = vpop.permute.xlu2 %2208  ;;  %v4365_v26 = vld [vmem:[%s3646_s30 + $0x84] sm:$0xff]   ;;  %v1985_v19 = vunpack.c.l.b16 %v3003_v22 }
  0xe8   : > { %2947 = vmatmul.msk.bf16.gmra.mxu1 %vm812_vm5, %v1557_v25  ;;  %2344 = vrot.lane.b32.xlu2 %v2307_v60, %s3563_s4  ;;  %v3253_v25 = vld [vmem:[%s3646_s30 + $0x78] sm:$0xf0]  ;;  %v2136_v60 = vrot.slane %v2134_v59, 1  ;;  %v1289_v24 = vshll.u32 %v4365_v26, 16  ;;  %v1527_v59 = vsel %vm735_vm3, %v3885_v50, %v4311_v48  ;;  %v1287_v50 = vshrl.u32 %v4365_v26, 16 }
  0xe9   : > { %592 = vrot.lane.b32.xlu1 %v501_v53, %s3564_s5  ;;  %v4368_v53 = vld [vmem:[%s3646_s30 + $0x84] sm:$0xf0]  ;;  %v3255_v54 = vor.u32 %v3254_v28, %v3253_v25 }
  0xea   : > { %v3470_v29 = vor.u32 %v3469_v12, %v4368_v53  ;;  %v1291_v48 = vrot.slane %v1289_v24, 1  ;;  %v4429_v12 = vld [vmem:[%s3646_s30 + $0x84] sm:$0xff]  }
  0xeb   : > { %v1511_v46 = vpop.permute.xlu1 %1510  ;;  %2352 = vrot.lane.b32.xlu0 %v2319_v36, %s3563_s4  ;;  %v4374_v36 = vor.u32 %v2131_v27, %v2127_v7  ;;  %v2321_v27 = vrot.slane %v4332_v45, 1  ;;  %v3472_v45 = vld [vmem:[%s3646_s30 + $0xcc] sm:$0xe] }
  0xec   : > { %v1575_v10 = vsel %vm768_vm4, %v1543_v37, %v1511_v46  ;;  %v3324_v37 = vld [vmem:[%s3646_s30 + $0xc0] sm:$0xe] }
  0xed   : > { %v2207_v4 = vpop.permute.xlu0 %2206  ;;  %2956 = vmatmul.msk.bf16.vlgmr.msrb.gmra.mxu3 %vm812_vm5, %v1575_v10  ;;  %v2137_v17 = vsel %vm381_vm1, %v4374_v36, %v2136_v60  ;;  %v3007_v60 = vld [vmem:[%s3646_s30 + $0xd4] sm:$0x1] }
  0xee   : > { %v2367_v51 = vsel %vm735_vm3, %v4343_v5, %v2207_v4  ;;  %v3325_v4 = vor.u32 %v3324_v37, %v3323_v33  ;;  %v3475_v33 = vld [vmem:[%s3646_s30 + $0x9c] sm:$0xe] }
  0xef   : > { %v2399_v63 = vsel %vm768_vm4, %v2367_v51, %v4291_v56  ;;  %v2309_v56 = vrot.slane %v2000_v0, 1  ;;  %v4376_v40 = vpop.permute.xlu2 %584  ;;  %v2141_v51 = vshll.u32 %v4349_v8, 16  ;;  %v685_v0 = vrot.slane %v3255_v54, 1 }
  0xf0   : > { %3034 = vmatmul.msk.bf16.gmra.mxu2 %vm812_vm5, %v2399_v63  ;;  %721 = vrot.lane.b32.xlu2 %v684_v20, %s3563_s4  ;;  %v2139_v20 = vshrl.u32 %v4349_v8, 16  ;;  %v2320_v7 = vrot.slane %v3325_v4, 1  ;;  %v1468_v54 = vrot.slane %v3470_v29, 1 }
  0xf1   : > { %1504 = vrot.lane.b32.xlu1 %v1467_v14, %s3563_s4  ;;  %v2310_v38 = vsel %vm654_vm0, %v2308_v58, %v2309_v56  ;;  %v1144_v14 = vunpack.c.l.b16 %v2916_v18  ;;  %v2143_v56 = vrot.slane %v2141_v51, 1  ;;  %v687_v44 = vsel %vm654_vm0, %v685_v0, %v686_v3 }
  0xf2   : > { %v2322_v37 = vsel %vm654_vm0, %v2320_v7, %v2321_v27 }
  0xf3   : > { %v712_v30 = vpop.permute.xlu1 %711  ;;  %1376 = vrot.lane.b32.xlu0 %v1285_v15, %s3564_s5  ;;  %v512_v15 = vrot.slane %v510_v52, 1  ;;  %v2144_v53 = vor.u32 %v2143_v56, %v2139_v20  ;;  %v3473_v20 = vor.u32 %v3472_v45, %v3471_v9  ;;  %v2187_v56 = vshrl.u32 %v4398_v13, 16 }
  0xf5   : > { %v583_v16 = vpop.permute.xlu0 %582 }
  0xf6   : > { %v745_v46 = vsel %vm735_vm3, %v4172_v47, %v583_v16  ;;  %v4392_v47 = vpack.c.b16 %v1985_v19, %v1985_v19  ;;  %v513_v19 = vsel %vm381_vm1, %v4166_v41, %v512_v15  ;;  %v2917_v41 = vld [vmem:[%s3646_s30 + $0x98] sm:$0x1] }
  0xf7   : > { %v778_v10 = vsel %vm768_vm4, %v745_v46, %v712_v30  ;;  %v1160_v30 = vpack.c.b16 %v1144_v14, %v1144_v14  ;;  %v4408_v25 = vpop.permute.xlu2 %1496  ;;  %v2189_v14 = vshll.u32 %v4398_v13, 16  ;;  %v1145_v7 = vunpack.c.l.b16 %v2917_v41 }
  0xf8   : > { %2862 = vmatmul.msk.bf16.gmra.mxu0 %vm812_vm5, %v778_v10  ;;  %2218 = vrot.lane.b32.xlu2 %v2137_v17, %s3564_s5  ;;  %v2146_v22 = vshll.u32 %v4392_v47, 16  ;;  %v2369_v10 = vsel %vm735_vm3, %v3914_v43, %v4340_v21  ;;  %v1292_v17 = vor.u32 %v1291_v48, %v1287_v50 }
  0xf9   : > { %2346 = vrot.lane.b32.xlu1 %v2310_v38, %s3563_s4  ;;  %v1294_v16 = vshll.u32 %v1160_v30, 16  ;;  %v1989_v38 = vunpack.c.l.b16 %v3007_v60  ;;  %v1469_v18 = vrot.slane %v1160_v30, 1  ;;  %v4447_v9 = vpack.c.b16 %v1145_v7, %v1145_v7 }
  0xfa   : > { %v2148_v46 = vrot.slane %v2146_v22, 1  ;;  %v2191_v22 = vrot.slane %v2189_v14, 1 }
  0xfb   : > { %v1385_v63 = vpop.permute.xlu1 %1384  ;;  %2226 = vrot.lane.b32.xlu0 %v2185_v35, %s3564_s5  ;;  %v3477_v35 = vld [vmem:[%s3646_s30 + $0x84] sm:$0xf0]  ;;  %v1296_v4 = vrot.slane %v1294_v16, 1  ;;  %v2005_v3 = vpack.c.b16 %v1989_v38, %v1989_v38  ;;  %v1470_v27 = vsel %vm654_vm0, %v1468_v54, %v1469_v18  ;;  %v1306_v54 = vshll.u32 %v4447_v9, 16 }
  0xfc   : > { %v1545_v43 = vsel %vm735_vm3, %v4185_v23, %v1385_v63  ;;  %v2149_v0 = vsel %vm381_vm1, %v2144_v53, %v2148_v46  ;;  %v3478_v63 = vld [vmem:[%s3646_s30 + $0x84] sm:$0xe]  ;;  %v2192_v48 = vor.u32 %v2191_v22, %v2187_v56 }
  0xfd   : > { %v1495_v58 = vpop.permute.xlu0 %1494  ;;  %v1297_v23 = vsel %vm381_vm1, %v1292_v17, %v1296_v4  ;;  %v2194_v30 = vshll.u32 %v2005_v3, 16  ;;  %v1308_v17 = vrot.slane %v1306_v54, 1  ;;  %v4488_v56 = vld [vmem:[%s3646_s30 + $0x60] sm:$0xff]  }
  0xfe   : > { %v1559_v28 = vsel %vm768_vm4, %v1527_v59, %v1495_v58  ;;  %v3476_v59 = vor.u32 %v3475_v33, %v4352_v6  ;;  %v232_v58 = vld [vmem:[%s3646_s30 + $0x8c] sm:$0x1]  ;;  %v2312_v6 = vrot.slane %v4392_v47, 1  ;;  %v747_v33 = vsel %vm735_vm3, %v3940_v55, %v4376_v40 }
  0xff   : > { %2948 = vmatmul.msk.bf16.gmra.mxu1 %vm812_vm5, %v1559_v28  ;;  %v1515_v15 = vpop.permute.xlu2 %1514  ;;  %v2323_v28 = vrot.slane %v3473_v20, 1  ;;  %v360_v29 = vunpack.c.l.b16 %v232_v58  ;;  %v2196_v16 = vrot.slane %v2194_v30, 1  ;;  %v515_v40 = vshrl.u32 %v4429_v12, 16 }
 0x100   : > { %2354 = vrot.lane.b32.xlu2 %v2322_v37, %s3563_s4  ;;  %v2311_v45 = vrot.slane %v3476_v59, 1  ;;  %v1309_v7 = vsel %vm381_vm1, %v4374_v36, %v1308_v17 }
 0x101   : > { %723 = vrot.lane.b32.xlu1 %v687_v44, %s3563_s4  ;;  %v2324_v44 = vrot.slane %v2005_v3, 1  ;;  %v376_v18 = vpack.c.b16 %v360_v29, %v360_v29  ;;  %v2197_v55 = vsel %vm381_vm1, %v2192_v48, %v2196_v16  ;;  %v3285_v3 = vld [vmem:[%s3646_s30 + $0x90] sm:$0xf0]  ;;  %v4501_v48 = vld [vmem:[%s4729_s2] ss:$0 sm:$0xff] }
 0x103   : > { %v2337_v52 = vpop.permute.xlu1 %2336  ;;  %594 = vrot.lane.b32.xlu0 %v513_v19, %s3564_s5  ;;  %v517_v19 = vshll.u32 %v4429_v12, 16  ;;  %v2325_v38 = vsel %vm654_vm0, %v2323_v28, %v2324_v44  ;;  %v522_v41 = vshll.u32 %v376_v18, 16  ;;  %v689_v14 = vrot.slane %v376_v18, 1 }
 0x104   : > { %v2401_v51 = vsel %vm768_vm4, %v2369_v10, %v2337_v52  ;;  %v2313_v10 = vsel %vm654_vm0, %v2311_v45, %v2312_v6  ;;  %v3479_v52 = vor.u32 %v3478_v63, %v3477_v35 }
 0x105   : > { %v1513_v21 = vpop.permute.xlu0 %1512  ;;  %3035 = vmatmul.msk.bf16.gmra.mxu2 %vm812_vm5, %v2401_v51  ;;  %v524_v35 = vrot.slane %v522_v41, 1 }
 0x106   : > { %v1577_v24 = vsel %vm768_vm4, %v1545_v43, %v1513_v21  ;;  %v688_v51 = vrot.slane %v3479_v52, 1 }
 0x107   : > { %2957 = vmatmul.msk.bf16.gmra.mxu3 %vm812_vm5, %v1577_v24  ;;  %v716_v46 = vpop.permute.xlu2 %715  ;;  %v3286_v24 = vld [vmem:[%s3646_s30 + $0x90] sm:$0xe] }
 0x108   : > { %1378 = vrot.lane.b32.xlu2 %v1297_v23, %s3564_s5  ;;  %v690_v59 = vsel %vm654_vm0, %v688_v51, %v689_v14  ;;  %v3287_v23 = vor.u32 %v3286_v24, %v3285_v3 }
 0x109   : > { %2220 = vrot.lane.b32.xlu1 %v2149_v0, %s3564_s5 }
 0x10a   : > { %v1471_v36 = vrot.slane %v3287_v23, 1 }
 0x10b   : > { %v1369_v60 = vpop.permute.xlu1 %1368  ;;  %1506 = vrot.lane.b32.xlu0 %v1470_v27, %s3563_s4 }
 0x10c   : > { %v1529_v50 = vsel %vm735_vm3, %v4343_v5, %v1369_v60  ;;  %v858_v60 = vpop.f32.mrf.mxu0 }
 0x10d   : > { %v714_v37 = vpop.permute.xlu0 %713  ;;  %v1561_v53 = vsel %vm768_vm4, %v1529_v50, %v4408_v25  ;;  %v519_v25 = vrot.slane %v517_v19, 1 }
 0x10e   : > { %v780_v47 = vsel %vm768_vm4, %v747_v33, %v714_v37 }
 0x10f   : > { %2863 = vmatmul.msk.bf16.gmra.mxu0 %vm812_vm5, %v780_v47  ;;  %2949 = vmatmul.msk.bf16.gmra.mxu1 %vm812_vm5, %v1561_v53  ;;  %v520_v43 = vor.u32 %v519_v25, %v515_v40 }
 0x110   : > { %2228 = vrot.lane.b32.xlu2 %v2197_v55, %s3564_s5 }
 0x111   : > { %2356 = vrot.lane.b32.xlu1 %v2325_v38, %s3563_s4  ;;  %v1389_v0 = vpop.permute.xlu2 %1388  ;;  %v525_v58 = vsel %vm381_vm1, %v520_v43, %v524_v35 }
 0x112   : > { %v1549_v54 = vsel %vm735_vm3, %v4079_v1, %v1389_v0 }
 0x113   : > { %v2211_v4 = vpop.permute.xlu1 %2210  ;;  %2348 = vrot.lane.b32.xlu0 %v2313_v10, %s3563_s4 }
 0x114   : > { %v2371_v22 = vsel %vm735_vm3, %v4488_v56, %v2211_v4  ;;  %v860_v53 = vpop.f32.mrf.mxu0 }
 0x115   : > { %v1387_v21 = vpop.permute.xlu0 %1386  ;;  %v861_v47 = vadd.f32 %v4501_v48, %v860_v53 }
 0x116   : > { %v1547_v20 = vsel %vm735_vm3, %v3960_v34, %v1387_v21 }
 0x117   : > { %v1579_v27 = vsel %vm768_vm4, %v1547_v20, %v1515_v15  ;;  %v1472_v15 = vrot.slane %v4447_v9, 1 }
 0x118   : > { %2958 = vmatmul.msk.bf16.gmra.mxu3 %vm812_vm5, %v1579_v27  ;;  %596 = vrot.lane.b32.xlu2 %v525_v58, %s3564_s5 }
 0x119   : > { %1380 = vrot.lane.b32.xlu1 %v1309_v7, %s3564_s5  ;;  %v2341_v44 = vpop.permute.xlu2 %2340 }
 0x11b   : > { %v587_v63 = vpop.permute.xlu1 %586  ;;  %725 = vrot.lane.b32.xlu0 %v690_v59, %s3563_s4  ;;  %v4503_v16 = vpop.f32.mrf.mxu3 }
 0x11c   : > { %v749_v34 = vsel %vm735_vm3, %v4343_v5, %v587_v63  ;;  %v1473_v5 = vsel %vm654_vm0, %v1471_v36, %v1472_v15 }
 0x11d   : > { %v2339_v30 = vpop.permute.xlu0 %2338  ;;  %v782_v28 = vsel %vm768_vm4, %v749_v34, %v716_v46  ;;  %v859_v46 = vadd.f32 %v4501_v48, %v858_v60 }
 0x11e   : > { %v2403_v29 = vsel %vm768_vm4, %v2371_v22, %v2339_v30 }
 0x11f   : > { %2864 = vmatmul.msk.bf16.gmra.mxu0 %vm812_vm5, %v782_v28  ;;  %3036 = vmatmul.msk.bf16.gmra.mxu2 %vm812_vm5, %v2403_v29 }
 0x120   : > { %1508 = vrot.lane.b32.xlu2 %v1473_v5, %s3563_s4  ;;  %s175_s4 = sand.u32 1, %s3545_s13  }
 0x121   : > { %v1373_v33 = vpop.permute.xlu2 %1372  ;;  %s2852_s6 = sshll.u32 %s175_s4, 7 }
 0x122   : > { %s4524_s7 = scalar_lea.vmem [#allocation3], %s2852_s6  ;;  %v1533_v59 = vsel %vm735_vm3, %v4488_v56, %v1373_v33 }
 0x123   : > { %v2474_v9 = vpop.f32.mrf.mxu2  ;;  %v1499_v45 = vpop.permute.xlu1 %1498  ;;  %s2761_s11 = sshll.u32 %s4524_s7, 4  ;;  %s2762_s11 = int_to_ptr.vmem [resolvable:$true] %s2761_s11 }
 0x124   : > { %v4521_v4 = vpop.f32.mrf.mxu3 }
 0x125   : > { %v1634_v6 = vpop.f32.mrf.mxu1  ;;  %v1371_v50 = vpop.permute.xlu0 %1370 }
 0x126   : > { %v1531_v19 = vsel %vm735_vm3, %v4003_v39, %v1371_v50  ;;  %v1746_v38 = vadd.f32 %v1634_v6, %v859_v46 }
 0x127   : > { %v1563_v37 = vsel %vm768_vm4, %v1531_v19, %v1499_v45 }
 0x128   : > { %2950 = vmatmul.msk.bf16.gmra.mxu1 %vm812_vm5, %v1563_v37  ;;  %v2586_v1 = vadd.f32 %v2474_v9, %v1746_v38 }
 0x12a   : > { %v2223_v25 = vpop.permute.xlu2 %2222 }
 0x12b   : > { %v1517_v18 = vpop.permute.xlu1 %1516  ;;  %v2476_v41 = vpop.f32.mrf.mxu2  ;;  %v2383_v30 = vsel %vm735_vm3, %v4169_v62, %v2223_v25 }
 0x12c   : > { %v1581_v39 = vsel %vm768_vm4, %v1549_v54, %v1517_v18 }
 0x12d   : > { %v1636_v10 = vpop.f32.mrf.mxu1  ;;  %v2213_v52 = vpop.permute.xlu0 %2212  ;;  %2959 = vmatmul.msk.bf16.gmra.mxu3 %vm812_vm5, %v1581_v39 }
 0x12e   : > { %v1747_v55 = vadd.f32 %v1636_v10, %v861_v47  ;;  %v2373_v40 = vsel %vm735_vm3, %v4040_v49, %v2213_v52 }
 0x12f   : > { %v2405_v17 = vsel %vm768_vm4, %v2373_v40, %v2341_v44 }
 0x130   : > { %v2587_v51 = vadd.f32 %v2476_v41, %v1747_v55  ;;  %3037 = vmatmul.msk.bf16.gmra.mxu2 %vm812_vm5, %v2405_v17  ;;  %v4530_v24 = vpop.f32.mrf.mxu3 }
 0x132   : > { %v3154_v14 = vpack.c.bf16 %v2587_v51, %v2586_v1  ;;  %v591_v0 = vpop.permute.xlu2 %590 }
 0x133   : > { %v718_v43 = vpop.permute.xlu1 %717  ;;  %v2479_v20 = vpop.f32.mrf.mxu2  ;;  %v753_v46 = vsel %vm735_vm3, %v4488_v56, %v591_v0 }
 0x134   : > { %3155 = vst [vmem:[%s4524_s7] sm:$0xff] %v3154_v14  }
 0x135   : > { %v589_v35 = vpop.permute.xlu0 %588  ;;  %v863_v21 = vpop.f32.mrf.mxu0 }
 0x136   : > { %v751_v49 = vsel %vm735_vm3, %v4072_v42, %v589_v35  ;;  %v864_v34 = vadd.f32 %v4501_v48, %v863_v21 }
 0x137   : > { %v784_v3 = vsel %vm768_vm4, %v751_v49, %v718_v43 }
 0x138   : > { %2865 = vmatmul.msk.bf16.gmra.mxu0 %vm812_vm5, %v784_v3  ;;  %v4538_v36 = vpop.f32.mrf.mxu3 }
 0x13a   : > { %v1503_v63 = vpop.permute.xlu2 %1502 }
 0x13b   : > { %v2215_v7 = vpop.permute.xlu1 %2214  ;;  %v2481_v45 = vpop.f32.mrf.mxu2 }
 0x13c   : > { %v1639_v27 = vpop.f32.mrf.mxu1  ;;  %v2375_v29 = vsel %vm735_vm3, %v4125_v2, %v2215_v7 }
 0x13d   : > { %v1501_v58 = vpop.permute.xlu0 %1500  ;;  %v865_v42 = vpop.f32.mrf.mxu0  ;;  %v1748_v15 = vadd.f32 %v1639_v27, %v864_v34 }
 0x13e   : > { %v1565_v23 = vsel %vm768_vm4, %v1533_v59, %v1501_v58  ;;  %v866_v22 = vadd.f32 %v4501_v48, %v865_v42 }
 0x13f   : > { %2951 = vmatmul.msk.bf16.gmra.mxu1 %vm812_vm5, %v1565_v23  ;;  %v2588_v19 = vadd.f32 %v2479_v20, %v1748_v15 }
 0x142   : > { %v2345_v50 = vpop.permute.xlu2 %2344 }
 0x143   : > { %v2351_v28 = vpop.permute.xlu1 %2350 }
 0x144   : > { %v1641_v44 = vpop.f32.mrf.mxu1  ;;  %v2415_v60 = vsel %vm768_vm4, %v2383_v30, %v2351_v28  ;;  %v3409_v30 = vld [vmem:[%s3646_s30 + $0x78] sm:$0xff]  }
 0x145   : > { %v1749_v5 = vadd.f32 %v1641_v44, %v866_v22  ;;  %v2343_v9 = vpop.permute.xlu0 %2342  ;;  %3042 = vmatmul.msk.bf16.vlgmr.msra.gmra.mxu3 %vm812_vm5, %v2415_v60 }
 0x146   : > { %v2407_v6 = vsel %vm768_vm4, %v2375_v29, %v2343_v9 }
 0x147   : > { %v2589_v33 = vadd.f32 %v2481_v45, %v1749_v5  ;;  %3038 = vmatmul.msk.bf16.gmra.mxu2 %vm812_vm5, %v2407_v6 }
 0x148   : > { %v2484_v18 = vpop.f32.mrf.mxu2 }
 0x149   : > { %v3159_v62 = vpack.c.bf16 %v2589_v33, %v2588_v19 }
 0x14a   : > { %v4549_v37 = vpop.f32.mrf.mxu3  ;;  %v722_v39 = vpop.permute.xlu2 %721 }
 0x14b   : > { %3326 = vst [vmem:[%s4524_s7 + $0x8] sm:$0xff] %v3159_v62   ;;  %v1375_v53 = vpop.permute.xlu1 %1374 }
 0x14c   : > { %v868_v2 = vpop.f32.mrf.mxu0  ;;  %v1535_v47 = vsel %vm735_vm3, %v4158_v31, %v1375_v53  ;;  %v1644_v38 = vpop.f32.mrf.mxu1  ;;  %v3410_v53 = vld [vmem:[%s3646_s30 + $0xc0] sm:$0xff]   ;;  %s3054_s30 = sshll.u32 %s3553_s15, 7  ;;  %s2747_s15 = scalar_lea.sflag [#allocation4], %s175_s4 }
 0x14d   : > { %v720_v54 = vpop.permute.xlu0 %719  ;;  %v1567_v52 = vsel %vm768_vm4, %v1535_v47, %v1503_v63  ;;  %v869_v55 = vadd.f32 %v4501_v48, %v868_v2  ;;  %v919_v47 = vadd.f32 %v4501_v48, %v4503_v16  ;;  %s2760_s10 = scalar_lea.hbm %s4730_s3, %s3054_s30 }
 0x14e   : > { %v786_v10 = vsel %vm768_vm4, %v753_v46, %v720_v54  ;;  %s2763_s18 = sshll.u32 %s2760_s10, 4  ;;  %s2764_s18 = int_to_ptr.hbm [resolvable:$true] %s2763_s18 }
 0x14f   : > { %2866 = vmatmul.msk.bf16.gmra.mxu0 %vm812_vm5, %v786_v10  ;;  %2952 = vmatmul.msk.bf16.gmra.mxu1 %vm812_vm5, %v1567_v52  ;;  %v1750_v31 = vadd.f32 %v1644_v38, %v869_v55  ;;  %s3494_s19 = sshra.s32 %s2764_s18, 4  ;;  %s3495_s19 = int_to_ptr.hbm [resolvable:$true] %s3494_s19 }
 0x150   : > { %v2486_v35 = vpop.f32.mrf.mxu2  ;;  %s3496_s21 = scalar_lea.hbm %s3495_s19, 128  ;;  %p3501_p1 = scmp.lt.s32.totalorder %s3495_s19, %s4730_s3 }
 0x151   : > { %v2590_v21 = vadd.f32 %v2484_v18, %v1750_v31  ;;  %p3497_p12 = scmp.ne.s32.totalorder %s3495_s19, %s3496_s21  ;;  %p3502_p2 = scmp.lt.s32.totalorder %s3500_s27, %s3496_s21 }
 0x152   : > { %v4561_v40 = vpop.f32.mrf.mxu3  ;;  %v2219_v49 = vpop.permute.xlu2 %2218 }
 0x153   : > { %v2225_v56 = vpop.permute.xlu1 %2224  ;;  %v2379_v45 = vsel %vm735_vm3, %v4324_v57, %v2219_v49  ;;  %p3498_p13 = pnand %p3497_p12, %p3626_p4  ;;  %p3503_p3 = por %p3502_p2, %p3501_p1 }
 0x154   : > { %v870_v25 = vpop.f32.mrf.mxu0  ;;  %v1646_v1 = vpop.f32.mrf.mxu1  ;;  %v2385_v7 = vsel %vm735_vm3, %v4196_v32, %v2225_v56 }
 0x155   : > { %v871_v41 = vadd.f32 %v4501_v48, %v870_v25  ;;  %v2217_v17 = vpop.permute.xlu0 %2216  ;;  %p3499_p0 = pneg %p3498_p13 }
 0x156   : > { %v2377_v51 = vsel %vm735_vm3, %v4207_v11, %v2217_v17 }
 0x157   : > { %v1751_v14 = vadd.f32 %v1646_v1, %v871_v41  ;;  %v2409_v43 = vsel %vm768_vm4, %v2377_v51, %v2345_v50  ;;  %p3504_p5 = pnand %p3503_p3, %p3499_p0 }
 0x158   : > { %3039 = vmatmul.msk.bf16.gmra.mxu2 %vm812_vm5, %v2409_v43 }
 0x159   : > { %v2591_v0 = vadd.f32 %v2486_v35, %v1751_v14 }
 0x15a   : > { %v2355_v42 = vpop.permute.xlu2 %2354 }
 0x15b   : > { %v3164_v3 = vpack.c.bf16 %v2591_v0, %v2590_v21  ;;  %v593_v20 = vpop.permute.xlu1 %592  ;;  %v4573_v59 = vpop.f32.mrf.mxu3 }
 0x15c   : > { %v755_v27 = vsel %vm735_vm3, %v4240_v61, %v593_v20  ;;  %v873_v63 = vpop.f32.mrf.mxu0 }
 0x15d   : > { %3327 = vst [vmem:[%s4524_s7 + $0x10] sm:$0xff] %v3164_v3   ;;  %v2353_v11 = vpop.permute.xlu0 %2352  ;;  %v788_v58 = vsel %vm768_vm4, %v755_v27, %v722_v39  ;;  %v874_v60 = vadd.f32 %v4501_v48, %v873_v63 }
 0x15e   : > { %v2417_v23 = vsel %vm768_vm4, %v2385_v7, %v2353_v11 }
 0x15f   : > { %2867 = vmatmul.msk.bf16.gmra.mxu0 %vm812_vm5, %v788_v58  ;;  %3043 = vmatmul.msk.bf16.gmra.mxu3 %vm812_vm5, %v2417_v23 }
 0x162   : > { %v2489_v34 = vpop.f32.mrf.mxu2  ;;  %v1379_v50 = vpop.permute.xlu2 %1378 }
 0x163   : > { %v1505_v15 = vpop.permute.xlu1 %1504  ;;  %v4582_v44 = vpop.f32.mrf.mxu3  ;;  %v1539_v43 = vsel %vm735_vm3, %v4365_v26, %v1379_v50 }
 0x164   : > { %v875_v29 = vpop.f32.mrf.mxu0 }
 0x165   : > { %v1377_v32 = vpop.permute.xlu0 %1376  ;;  %v1649_v22 = vpop.f32.mrf.mxu1  ;;  %v876_v5 = vadd.f32 %v4501_v48, %v875_v29 }
 0x166   : > { %v1537_v61 = vsel %vm735_vm3, %v3409_v30, %v1377_v32  ;;  %v1752_v9 = vadd.f32 %v1649_v22, %v874_v60 }
 0x167   : > { %v1569_v28 = vsel %vm768_vm4, %v1537_v61, %v1505_v15 }
 0x168   : > { %2953 = vmatmul.msk.bf16.gmra.mxu1 %vm812_vm5, %v1569_v28  ;;  %v2592_v18 = vadd.f32 %v2489_v34, %v1752_v9 }
 0x16a   : > { %v2491_v38 = vpop.f32.mrf.mxu2  ;;  %v2229_v16 = vpop.permute.xlu2 %2228 }
 0x16b   : > { %v2347_v6 = vpop.permute.xlu1 %2346  ;;  %v2389_v11 = vsel %vm735_vm3, %v4398_v13, %v2229_v16  ;;  %v924_v13 = vadd.f32 %v4501_v48, %v4530_v24 }
 0x16c   : > { %v2411_v62 = vsel %vm768_vm4, %v2379_v45, %v2347_v6 }
 0x16d   : > { %v2227_v19 = vpop.permute.xlu0 %2226  ;;  %v1651_v33 = vpop.f32.mrf.mxu1  ;;  %3040 = vmatmul.msk.bf16.gmra.mxu2 %vm812_vm5, %v2411_v62  ;;  %v926_v62 = vadd.f32 %v4501_v48, %v4538_v36 }
 0x16e   : > { %v2387_v2 = vsel %vm735_vm3, %v3410_v53, %v2227_v19  ;;  %v1753_v46 = vadd.f32 %v1651_v33, %v876_v5 }
 0x16f   : > { %v2419_v54 = vsel %vm768_vm4, %v2387_v2, %v2355_v42 }
 0x170   : > { %v2593_v10 = vadd.f32 %v2491_v38, %v1753_v46  ;;  %v1694_v52 = vpop.f32.mrf.mxu3  ;;  %3044 = vmatmul.msk.bf16.gmra.mxu3 %vm812_vm5, %v2419_v54 }
 0x171   : > { %v4597_v39 = vadd.f32 %v1694_v52, %v919_v47 }
 0x172   : > { %v3169_v55 = vpack.c.bf16 %v2593_v10, %v2592_v18  ;;  %v597_v3 = vpop.permute.xlu2 %596 }
 0x173   : > { %v724_v56 = vpop.permute.xlu1 %723  ;;  %v2494_v1 = vpop.f32.mrf.mxu2  ;;  %v759_v9 = vsel %vm735_vm3, %v4429_v12, %v597_v3  ;;  %v934_v3 = vadd.f32 %v4501_v48, %v4573_v59 }
 0x174   : > { %3328 = vst [vmem:[%s4524_s7 + $0x18] sm:$0xff] %v3169_v55   ;;  %v929_v55 = vadd.f32 %v4501_v48, %v4549_v37 }
 0x175   : > { %v595_v25 = vpop.permute.xlu0 %594  ;;  %v878_v41 = vpop.f32.mrf.mxu0 }
 0x176   : > { %v757_v31 = vsel %vm735_vm3, %v3409_v30, %v595_v25  ;;  %v879_v0 = vadd.f32 %v4501_v48, %v878_v41  ;;  %v931_v41 = vadd.f32 %v4501_v48, %v4561_v40 }
 0x177   : > { %v790_v17 = vsel %vm768_vm4, %v757_v31, %v724_v56 }
 0x178   : > { %2868 = vmatmul.msk.bf16.gmra.mxu0 %vm812_vm5, %v790_v17  ;;  %v4608_v20 = vpop.f32.mrf.mxu3 }
 0x17a   : > { %v1509_v29 = vpop.permute.xlu2 %1508 }
 0x17b   : > { %v2221_v51 = vpop.permute.xlu1 %2220  ;;  %v2496_v15 = vpop.f32.mrf.mxu2 }
 0x17c   : > { %v1654_v14 = vpop.f32.mrf.mxu1  ;;  %v2381_v23 = vsel %vm735_vm3, %v4349_v8, %v2221_v51 }
 0x17d   : > { %v1507_v35 = vpop.permute.xlu0 %1506  ;;  %v880_v21 = vpop.f32.mrf.mxu0  ;;  %v1754_v7 = vadd.f32 %v1654_v14, %v879_v0 }
 0x17e   : > { %v1571_v49 = vsel %vm768_vm4, %v1539_v43, %v1507_v35  ;;  %v881_v27 = vadd.f32 %v4501_v48, %v880_v21 }
 0x17f   : > { %2954 = vmatmul.msk.bf16.gmra.mxu1 %vm812_vm5, %v1571_v49  ;;  %v2594_v22 = vadd.f32 %v2494_v1, %v1754_v7 }
 0x183   : > { %v2357_v58 = vpop.permute.xlu1 %2356 }
 0x184   : > { %v1656_v26 = vpop.f32.mrf.mxu1  ;;  %v2421_v34 = vsel %vm768_vm4, %v2389_v11, %v2357_v58 }
 0x185   : > { %v1755_v63 = vadd.f32 %v1656_v26, %v881_v27  ;;  %v2349_v42 = vpop.permute.xlu0 %2348  ;;  %3045 = vmatmul.msk.bf16.gmra.mxu3 %vm812_vm5, %v2421_v34 }
 0x186   : > { %v2413_v32 = vsel %vm768_vm4, %v2381_v23, %v2349_v42  ;;  %v936_v23 = vadd.f32 %v4501_v48, %v4582_v44 }
 0x187   : > { %v2595_v30 = vadd.f32 %v2496_v15, %v1755_v63  ;;  %3041 = vmatmul.msk.bf16.gmra.mxu2 %vm812_vm5, %v2413_v32 }
 0x188   : > { %v2499_v19 = vpop.f32.mrf.mxu2 }
 0x189   : > { %v3174_v61 = vpack.c.bf16 %v2595_v30, %v2594_v22 }
 0x18a   : > { %v1699_v28 = vpop.f32.mrf.mxu3 }
 0x18b   : > { %3329 = vst [vmem:[%s4524_s7 + $0x20] sm:$0xff] %v3174_v61   ;;  %v4622_v8 = vadd.f32 %v1699_v28, %v924_v13  ;;  %v1381_v60 = vpop.permute.xlu1 %1380 }
 0x18c   : > { %v883_v5 = vpop.f32.mrf.mxu0  ;;  %v1541_v45 = vsel %vm735_vm3, %v4324_v57, %v1381_v60  ;;  %v1659_v6 = vpop.f32.mrf.mxu1 }
 0x18d   : > { %v726_v50 = vpop.permute.xlu0 %725  ;;  %v1573_v24 = vsel %vm768_vm4, %v1541_v45, %v1509_v29  ;;  %v884_v12 = vadd.f32 %v4501_v48, %v883_v5 }
 0x18e   : > { %v792_v33 = vsel %vm768_vm4, %v759_v9, %v726_v50 }
 0x18f   : > { %2869 = vmatmul.msk.bf16.gmra.mxu0 %vm812_vm5, %v792_v33  ;;  %2955 = vmatmul.msk.bf16.gmra.mxu1 %vm812_vm5, %v1573_v24  ;;  %v1756_v46 = vadd.f32 %v1659_v6, %v884_v12  ;;  %v921_v6 = vadd.f32 %v4501_v48, %v4521_v4 }
 0x190   : > { %v2501_v18 = vpop.f32.mrf.mxu2 }
 0x191   : > { %v2596_v10 = vadd.f32 %v2499_v19, %v1756_v46  ;;  %v1771_v19 = vadd.f32 %v4608_v20, %v921_v6 }
 0x192   : > { %v1701_v53 = vpop.f32.mrf.mxu3 }
 0x193   : > { %v4635_v2 = vadd.f32 %v1701_v53, %v926_v62 }
 0x194   : > { %v885_v57 = vpop.f32.mrf.mxu0  ;;  %v1661_v38 = vpop.f32.mrf.mxu1 }
 0x195   : > { %v886_v47 = vadd.f32 %v4501_v48, %v885_v57 }
 0x197   : > { %v1757_v54 = vadd.f32 %v1661_v38, %v886_v47 }
 0x199   : > { %v2597_v52 = vadd.f32 %v2501_v18, %v1757_v54 }
 0x19b   : > { %v3179_v56 = vpack.c.bf16 %v2597_v52, %v2596_v10  ;;  %v1704_v36 = vpop.f32.mrf.mxu3 }
 0x19c   : > { %v4640_v25 = vadd.f32 %v1704_v36, %v929_v55  ;;  %v888_v31 = vpop.f32.mrf.mxu0 }
 0x19d   : > { %3330 = vst [vmem:[%s4524_s7 + $0x28] sm:$0xff] %v3179_v56   ;;  %v889_v43 = vadd.f32 %v4501_v48, %v888_v31 }
 0x1a2   : > { %v2504_v1 = vpop.f32.mrf.mxu2 }
 0x1a3   : > { %v1706_v17 = vpop.f32.mrf.mxu3 }
 0x1a4   : > { %v4645_v16 = vadd.f32 %v1706_v17, %v931_v41  ;;  %v890_v14 = vpop.f32.mrf.mxu0 }
 0x1a5   : > { %v1664_v51 = vpop.f32.mrf.mxu1  ;;  %v891_v37 = vadd.f32 %v4501_v48, %v890_v14 }
 0x1a6   : > { %v1758_v35 = vadd.f32 %v1664_v51, %v889_v43 }
 0x1a8   : > { %v2598_v7 = vadd.f32 %v2504_v1, %v1758_v35 }
 0x1aa   : > { %v2506_v0 = vpop.f32.mrf.mxu2 }
 0x1ad   : > { %v1666_v49 = vpop.f32.mrf.mxu1 }
 0x1ae   : > { %v1759_v21 = vadd.f32 %v1666_v49, %v891_v37 }
 0x1b0   : > { %v2599_v40 = vadd.f32 %v2506_v0, %v1759_v21  ;;  %v1709_v27 = vpop.f32.mrf.mxu3 }
 0x1b1   : > { %v4651_v58 = vadd.f32 %v1709_v27, %v934_v3 }
 0x1b2   : > { %v3184_v11 = vpack.c.bf16 %v2599_v40, %v2598_v7 }
 0x1b3   : > { %v2509_v34 = vpop.f32.mrf.mxu2 }
 0x1b4   : > { %3331 = vst [vmem:[%s4524_s7 + $0x30] sm:$0xff] %v3184_v11  }
 0x1b5   : > { %v893_v26 = vpop.f32.mrf.mxu0 }
 0x1b6   : > { %v894_v59 = vadd.f32 %v4501_v48, %v893_v26 }
 0x1b8   : > { %v1711_v63 = vpop.f32.mrf.mxu3 }
 0x1b9   : > { %v4656_v42 = vadd.f32 %v1711_v63, %v936_v23 }
 0x1bb   : > { %v2511_v28 = vpop.f32.mrf.mxu2 }
 0x1bc   : > { %v1669_v15 = vpop.f32.mrf.mxu1 }
 0x1bd   : > { %v895_v32 = vpop.f32.mrf.mxu0  ;;  %v1760_v22 = vadd.f32 %v1669_v15, %v894_v59 }
 0x1be   : > { %v896_v30 = vadd.f32 %v4501_v48, %v895_v32 }
 0x1bf   : > { %v2600_v29 = vadd.f32 %v2509_v34, %v1760_v22 }
 0x1c4   : > { %v1671_v13 = vpop.f32.mrf.mxu1 }
 0x1c5   : > { %v1761_v61 = vadd.f32 %v1671_v13, %v896_v30 }
 0x1c7   : > { %v2601_v60 = vadd.f32 %v2511_v28, %v1761_v61 }
 0x1c8   : > { %v2534_v44 = vpop.f32.mrf.mxu3 }
 0x1c9   : > { %v3189_v5 = vpack.c.bf16 %v2601_v60, %v2600_v29  ;;  %v2610_v62 = vadd.f32 %v2534_v44, %v4597_v39 }
 0x1ca   : > { %v2514_v50 = vpop.f32.mrf.mxu2 }
 0x1cb   : > { %3332 = vst [vmem:[%s4524_s7 + $0x38] sm:$0xff] %v3189_v5  }
 0x1cc   : > { %v898_v9 = vpop.f32.mrf.mxu0  ;;  %v1674_v45 = vpop.f32.mrf.mxu1 }
 0x1cd   : > { %v899_v33 = vadd.f32 %v4501_v48, %v898_v9 }
 0x1cf   : > { %v1762_v46 = vadd.f32 %v1674_v45, %v899_v33 }
 0x1d0   : > { %v2536_v24 = vpop.f32.mrf.mxu3 }
 0x1d1   : > { %v2611_v12 = vadd.f32 %v2536_v24, %v1771_v19  ;;  %v2602_v4 = vadd.f32 %v2514_v50, %v1762_v46 }
 0x1d2   : > { %v2516_v18 = vpop.f32.mrf.mxu2 }
 0x1d3   : > { %v3214_v53 = vpack.c.bf16 %v2611_v12, %v2610_v62 }
 0x1d4   : > { %v900_v57 = vpop.f32.mrf.mxu0  ;;  %v1676_v38 = vpop.f32.mrf.mxu1 }
 0x1d5   : > { %v901_v47 = vadd.f32 %v4501_v48, %v900_v57  ;;  %3337 = vst [vmem:[%s4524_s7 + $0x60] sm:$0xff] %v3214_v53  }
 0x1d7   : > { %v1763_v54 = vadd.f32 %v1676_v38, %v901_v47 }
 0x1d9   : > { %v2603_v10 = vadd.f32 %v2516_v18, %v1763_v54 }
 0x1db   : > { %v3194_v52 = vpack.c.bf16 %v2603_v10, %v2602_v4  ;;  %v2519_v56 = vpop.f32.mrf.mxu2 }
 0x1dc   : > { %v903_v20 = vpop.f32.mrf.mxu0 }
 0x1dd   : > { %3333 = vst [vmem:[%s4524_s7 + $0x40] sm:$0xff] %v3194_v52   ;;  %v904_v31 = vadd.f32 %v4501_v48, %v903_v20 }
 0x1e2   : > { %v2539_v55 = vpop.f32.mrf.mxu3 }
 0x1e3   : > { %v2612_v17 = vadd.f32 %v2539_v55, %v4622_v8  ;;  %v2521_v49 = vpop.f32.mrf.mxu2 }
 0x1e4   : > { %v905_v39 = vpop.f32.mrf.mxu0 }
 0x1e5   : > { %v1679_v36 = vpop.f32.mrf.mxu1  ;;  %v906_v51 = vadd.f32 %v4501_v48, %v905_v39 }
 0x1e6   : > { %v1764_v14 = vadd.f32 %v1679_v36, %v904_v31 }
 0x1e8   : > { %v2604_v21 = vadd.f32 %v2519_v56, %v1764_v14 }
 0x1ea   : > { %v2541_v41 = vpop.f32.mrf.mxu3 }
 0x1eb   : > { %v2613_v1 = vadd.f32 %v2541_v41, %v4635_v2 }
 0x1ed   : > { %v3219_v43 = vpack.c.bf16 %v2613_v1, %v2612_v17  ;;  %v1681_v37 = vpop.f32.mrf.mxu1 }
 0x1ee   : > { %v1765_v35 = vadd.f32 %v1681_v37, %v906_v51 }
 0x1ef   : > { %3338 = vst [vmem:[%s4524_s7 + $0x68] sm:$0xff] %v3219_v43  }
 0x1f0   : > { %v2605_v0 = vadd.f32 %v2521_v49, %v1765_v35  ;;  %v2524_v11 = vpop.f32.mrf.mxu2 }
 0x1f2   : > { %v3199_v3 = vpack.c.bf16 %v2605_v0, %v2604_v21 }
 0x1f3   : > { %v2544_v7 = vpop.f32.mrf.mxu3 }
 0x1f4   : > { %3334 = vst [vmem:[%s4524_s7 + $0x48] sm:$0xff] %v3199_v3   ;;  %v2614_v8 = vadd.f32 %v2544_v7, %v4640_v25 }
 0x1f5   : > { %v908_v40 = vpop.f32.mrf.mxu0 }
 0x1f6   : > { %v909_v34 = vadd.f32 %v4501_v48, %v908_v40 }
 0x1f8   : > { %v2526_v30 = vpop.f32.mrf.mxu2 }
 0x1fb   : > { %v2546_v27 = vpop.f32.mrf.mxu3 }
 0x1fc   : > { %v2615_v2 = vadd.f32 %v2546_v27, %v4645_v16  ;;  %v1684_v26 = vpop.f32.mrf.mxu1 }
 0x1fd   : > { %v910_v63 = vpop.f32.mrf.mxu0  ;;  %v1766_v15 = vadd.f32 %v1684_v26, %v909_v34 }
 0x1fe   : > { %v3224_v23 = vpack.c.bf16 %v2615_v2, %v2614_v8  ;;  %v911_v32 = vadd.f32 %v4501_v48, %v910_v63 }
 0x1ff   : > { %v2606_v13 = vadd.f32 %v2524_v11, %v1766_v15 }
 0x200   : > { %3339 = vst [vmem:[%s4524_s7 + $0x70] sm:$0xff] %v3224_v23  }
 0x204   : > { %v1686_v59 = vpop.f32.mrf.mxu1 }
 0x205   : > { %v1767_v22 = vadd.f32 %v1686_v59, %v911_v32 }
 0x207   : > { %v2607_v61 = vadd.f32 %v2526_v30, %v1767_v22 }
 0x208   : > { %v2549_v25 = vpop.f32.mrf.mxu3 }
 0x209   : > { %v3204_v28 = vpack.c.bf16 %v2607_v61, %v2606_v13  ;;  %v2616_v9 = vadd.f32 %v2549_v25, %v4651_v58 }
 0x20a   : > { %v2529_v60 = vpop.f32.mrf.mxu2 }
 0x20b   : > { %3335 = vst [vmem:[%s4524_s7 + $0x50] sm:$0xff] %v3204_v28  }
 0x20c   : > { %v913_v16 = vpop.f32.mrf.mxu0  ;;  %v1689_v29 = vpop.f32.mrf.mxu1 }
 0x20d   : > { %v914_v5 = vadd.f32 %v4501_v48, %v913_v16 }
 0x20f   : > { %v1768_v19 = vadd.f32 %v1689_v29, %v914_v5 }
 0x210   : > { %v2551_v44 = vpop.f32.mrf.mxu3 }
 0x211   : > { %v2617_v45 = vadd.f32 %v2551_v44, %v4656_v42  ;;  %v2608_v42 = vadd.f32 %v2529_v60, %v1768_v19 }
 0x212   : > { %v2531_v58 = vpop.f32.mrf.mxu2 }
 0x213   : > { %v3229_v6 = vpack.c.bf16 %v2617_v45, %v2616_v9 }
 0x214   : > { %v915_v50 = vpop.f32.mrf.mxu0  ;;  %v1691_v24 = vpop.f32.mrf.mxu1 }
 0x215   : > { %v916_v33 = vadd.f32 %v4501_v48, %v915_v50  ;;  %3340 = vst [vmem:[%s4524_s7 + $0x78] sm:$0xff] %v3229_v6  }
 0x217   : > { %v1769_v62 = vadd.f32 %v1691_v24, %v916_v33 }
 0x219   : > { %v2609_v12 = vadd.f32 %v2531_v58, %v1769_v62 }
 0x21b   : > { %v3209_v53 = vpack.c.bf16 %v2609_v12, %v2608_v42 }
 0x21d   : > { %3336 = vst [vmem:[%s4524_s7 + $0x58] sm:$0xff] %v3209_v53  }
 0x21e   : > { %3507 = shalt.err (!%p3504_p5)
}
 0x21f   : > { %s3565_s4 = smov 64  }
 0x220   : > { %3345 = dma.vmem_to_hbm [thread:$0]  (%p3626_p4), %s2762_s11, 2048, %s2764_s18, %s2747_s15, %s3565_s4, %s3565_s4, %s3564_s5  }
 0x221 PF: > { %p3351_p6 = scmp.ge.s32.totalorder %s3561_s17, 2  ;;  %s2778_s6 = sand.u32 1, %s3541_s12  }
 0x222   : > { %s2779_s7 = scalar_lea.sflag [#allocation4], %s2778_s6 }
 0x223   : > { %p3348_p7 = pnand %p3351_p6, %p3633_p8 }
 0x225   : > { %p3349_p9 = pneg %p3348_p7 }
 0x227   : > { %3533 = dma.done.wait (%p3349_p9), %s2779_s7, 2048  }
 0x228   : > { %3535 = vsyncadd (%p3349_p9), %s2779_s7, 4294965248  ;;  %s16_s17 = sadd.s32 1, %s3561_s17   ;;  %s4733_s12 = smov %s3545_s13 }
 0x229   : > { %p13_p10 = scmp.ge.s32.totalorder %s16_s17, 4   ;;  %s4734_s13 = smov %s3549_s14 }
 0x22a   : > { %s4735_s14 = smov %s3639_s25  ;;  %s4736_s15 = smov %s3557_s16 }
 0x22b   : > { %s4737_s16 = smov %s4739_s20  ;;  %15 = sbr.rel (!%p13_p10) target bundleno = 4 (0x4), region = 72 }
 0x230   :  { %2785 = vsyncpa [#allocation4], 1 }
 0x231   :  { %2787 = vsyncpa [#allocation4 + $0x1], 1 }

</bundles_post_ra>
